<compile_context>
chip_gen: v6e
topology: v6e:2x2x1
jax: 0.10.0
libtpu: 0.0.40
codegen_flags: <defaults>
</compile_context>

<pallas_src>
import numpy as np
import jax
import jax.numpy as jnp
from jax.experimental import pallas as pl
from jax.experimental.pallas import tpu as pltpu


ROW_PAD = 256   # per-image-row lane width: W*C = 224, zero-padded to 256 lanes


# ---------------------------------------------------------------------------
# Host-side precomputed weight layouts (built once, not per forward call)
# ---------------------------------------------------------------------------
def _fused_row_map(w_t, w_in, k_pad, n_pad):
    """Fused, lane-padded row-map matrix for
    ConvTranspose2d(IC, OC, 3, stride=2, padding=1, output_padding=1).

    With input image rows laid out as lanes (iw, ic) zero-padded to k_pad and
    output rows as lanes (ow, oc) zero-padded to n_pad, the returned matrix
    R (2*k_pad, 2*n_pad) satisfies
        [x_row_j | x_row_{j+1}] @ R = [out_row_{2j} | out_row_{2j+1}]
    (x_row_{j+1} is all-zero for the last input row).  Block layout:
        R = [[R_kh1, R_kh2],
             [  0  , R_kh0]]
    where R_kh[iw*IC + ic, ow*OC + oc] = w_t[ic, oc, kh, kw], kw = ow - 2*iw + 1
    (zero where kw is outside [0, 2] -> width-direction pad/out_pad cropping).
    """
    ic, oc = w_t.shape[0], w_t.shape[1]
    w_out = 2 * w_in
    r = np.zeros((3, k_pad, n_pad), np.float32)
    for kh in range(3):
        for iw in range(w_in):
            for kw in range(3):
                ow = 2 * iw - 1 + kw
                if 0 <= ow < w_out:
                    r[kh, iw * ic:(iw + 1) * ic, ow * oc:(ow + 1) * oc] = \
                        w_t[:, :, kh, kw]
    fused = np.zeros((2 * k_pad, 2 * n_pad), np.float32)
    fused[:k_pad, :n_pad] = r[1]      # even row 2j   <- x_row_j     (kh = 1)
    fused[:k_pad, n_pad:] = r[2]      # odd  row 2j+1 <- x_row_j     (kh = 2)
    fused[k_pad:, n_pad:] = r[0]      # odd  row 2j+1 <- x_row_{j+1} (kh = 0)
    return fused


def _fused_bias(b, w_out, n_pad):
    """(1, 2*n_pad) bias row: bias tiled over (ow, oc) in both the even and
    odd halves; zero in the lane-padding positions."""
    row = np.zeros((n_pad,), np.float32)
    row[:w_out * b.shape[0]] = np.tile(b, w_out)
    return np.concatenate([row, row])[None, :]


# ---------------------------------------------------------------------------
# Fused decoder kernel
# ---------------------------------------------------------------------------
def _deconv_pair(x3, r_ref, b_ref):
    """One fused-matmul stride-2 / pad-1 / out_pad-1 / k=3 transposed conv.

    x3:    (Bt, H, Kpad) f32, lanes = (iw, ic) zero-padded to Kpad.
    r_ref: (2*Kpad, 2*Npad) bf16 fused row map [[R1, R2], [0, R0]].
    b_ref: (1, 2*Npad) f32 bias tiled for the even|odd halves.
    Returns (Bt, H, 2*Npad) f32: per input row j, [out_row_2j | out_row_2j+1].
    No activation applied; accumulation in f32.
    """
    bt, h, k = x3.shape
    # x shifted up by one row within each sample (last row -> zeros).
    xup = jnp.concatenate(
        [x3[:, 1:, :], jnp.zeros((bt, 1, k), x3.dtype)], axis=1)
    # Lane concat at an aligned 256 boundary, then one cast to bf16 for the MXU.
    xcat = jnp.concatenate([x3, xup], axis=-1).astype(jnp.bfloat16)  # (Bt, H, 2K)
    y = jnp.dot(xcat.reshape(bt * h, 2 * k), r_ref[...],
                preferred_element_type=jnp.float32)
    return (y + b_ref[...]).reshape(bt, h, r_ref.shape[1])


def decoder_kernel(h_ref, w1_ref, b1_ref, r2_ref, b2_ref, r3_ref, b3_ref,
                   o_ref):
    bt = h_ref.shape[0]

    # Layer 1: ConvTranspose2d(256, 32, 7) on a 1x1 input == FC + bias + ReLU.
    h = h_ref[...].astype(jnp.bfloat16)                               # (Bt, 256)
    x = jnp.dot(h, w1_ref[...], preferred_element_type=jnp.float32)   # (Bt, 7*256)
    x = jnp.maximum(x + b1_ref[...], 0.0)
    x = x.reshape(bt, 7, ROW_PAD)            # rows = height, lanes = (w, c) padded

    # Layer 2: ConvTranspose2d(32, 16, 3, s=2, p=1, op=1) + ReLU.
    y = _deconv_pair(x, r2_ref, b2_ref)      # (Bt, 7, 512) = [even | odd] rows
    y = jnp.maximum(y, 0.0)
    x = y.reshape(bt, 14, ROW_PAD)           # aligned 256-lane split -> 14 rows

    # Layer 3: ConvTranspose2d(16, 1, 3, s=2, p=1, op=1) + Sigmoid, then tanh.
    y = _deconv_pair(x, r3_ref, b3_ref)      # (Bt, 14, 56) = [even 28 | odd 28]
    y = jnp.tanh(jax.nn.sigmoid(y))

    o_ref[...] = y.reshape(bt, 28 * 28)      # row-major 28x28, lane-dense store


def decoder_forward(h_t, params, batch_block=None):
    B = h_t.shape[0]
    w1, b1, r2, b2, r3, b3 = params
    if batch_block is None:
        # Single grid step unless each half still feeds the MXU >= 128 rows in
        # layer 1 (B >= 256); only then is a 2-way "parallel" split worth it
        # (v7x's second TensorCore).  B % 16 keeps the split block 8-aligned.
        batch_block = B // 2 if (B >= 256 and B % 16 == 0) else B
    assert B % batch_block == 0 and (batch_block == B or batch_block % 8 == 0)
    grid_b = B // batch_block

    return pl.pallas_call(
        decoder_kernel,
        out_shape=jax.ShapeDtypeStruct((B, 28 * 28), jnp.float32),
        grid=(grid_b,),
        in_specs=[
            pl.BlockSpec((batch_block, 256), lambda i: (i, 0)),          # h_t
            pl.BlockSpec((256, 7 * ROW_PAD), lambda i: (0, 0)),          # w1 (bf16)
            pl.BlockSpec((1, 7 * ROW_PAD), lambda i: (0, 0)),            # b1 row (f32)
            pl.BlockSpec((2 * ROW_PAD, 2 * ROW_PAD), lambda i: (0, 0)),  # layer-2 fused map
            pl.BlockSpec((1, 2 * ROW_PAD), lambda i: (0, 0)),            # b2 row
            pl.BlockSpec((2 * ROW_PAD, 56), lambda i: (0, 0)),           # layer-3 fused map
            pl.BlockSpec((1, 56), lambda i: (0, 0)),                     # b3 row
        ],
        out_specs=pl.BlockSpec((batch_block, 28 * 28), lambda i: (i, 0)),
        compiler_params=pltpu.CompilerParams(
            dimension_semantics=("parallel",)),
    )(h_t, w1, b1, r2, b2, r3, b3)


# ---------------------------------------------------------------------------
# ActionNetwork in JAX (deterministic synthetic parameters)
# ---------------------------------------------------------------------------
class ActionNetworkPallas:
    """JAX/Pallas port of ActionNetwork (the ctor's input_size/output_size are
    unused by the torch forward; the decoder hard-codes 256-channel h_t)."""

    def __init__(self, key):
        k1, k2, k3, k4, k5, k6 = jax.random.split(key, 6)

        def u(k, shape, fan):
            s = 1.0 / jnp.sqrt(jnp.float32(fan))
            return jax.random.uniform(k, shape, jnp.float32, -s, s)

        # Raw (PyTorch-layout) parameters.
        self.w1 = u(k1, (256, 32, 7, 7), 256)      # ConvTranspose2d(256, 32, 7)
        self.b1 = u(k2, (32,), 256)
        self.w2 = u(k3, (32, 16, 3, 3), 32 * 9)    # ConvTranspose2d(32, 16, 3, ...)
        self.b2 = u(k4, (16,), 32 * 9)
        self.w3 = u(k5, (16, 1, 3, 3), 16 * 9)     # ConvTranspose2d(16, 1, 3, ...)
        self.b3 = u(k6, (1,), 16 * 9)

        # --- kernel-side weight layouts (precomputed once, not per call) ---
        # Layer 1: 1x1-input deconv == FC; output pixels ordered (kh, kw, oc),
        # each 224-wide row zero-padded to ROW_PAD lanes.
        w1_rows = np.asarray(self.w1).transpose(0, 2, 3, 1).reshape(256, 7, 224)
        w1_pad = np.zeros((256, 7, ROW_PAD), np.float32)
        w1_pad[:, :, :224] = w1_rows
        self.w1_flat = jnp.asarray(w1_pad.reshape(256, 7 * ROW_PAD), jnp.bfloat16)
        b1_pad = np.zeros((7, ROW_PAD), np.float32)
        b1_pad[:, :224] = np.tile(np.asarray(self.b1), 7)
        self.b1_row = jnp.asarray(b1_pad.reshape(1, 7 * ROW_PAD))

        # Layers 2/3: fused [[R1,R2],[0,R0]] row maps (bf16) + f32 bias rows.
        self.r2 = jnp.asarray(
            _fused_row_map(np.asarray(self.w2), 7, ROW_PAD, ROW_PAD),
            jnp.bfloat16)                                         # (512, 512)
        self.b2_row = jnp.asarray(_fused_bias(np.asarray(self.b2), 14, ROW_PAD))
        self.r3 = jnp.asarray(
            _fused_row_map(np.asarray(self.w3), 14, ROW_PAD, 28),
            jnp.bfloat16)                                         # (512, 56)
        self.b3_row = jnp.asarray(_fused_bias(np.asarray(self.b3), 28, 28))

    def params(self):
        return (self.w1_flat, self.b1_row, self.r2, self.b2_row,
                self.r3, self.b3_row)

    def forward(self, h_t, batch_block=None):
        return decoder_forward(h_t, self.params(), batch_block)


# ---------------------------------------------------------------------------
# Pure-JAX f32 reference (lax.conv_general_dilated) built from the raw params
# ---------------------------------------------------------------------------
def ref_forward(h_t, net):
    B = h_t.shape[0]
    # Layer 1 on a 1x1 input: out[b, kh, kw, oc] = sum_ic h[b, ic] * w1[ic, oc, kh, kw].
    y = jnp.einsum("bi,iohw->bhwo", h_t, net.w1) + net.b1        # (B, 7, 7, 32)
    y = jnp.maximum(y, 0.0)
    for w_t, b, act in ((net.w2, net.b2, "relu"), (net.w3, net.b3, "sigtanh")):
        wc = jnp.flip(w_t, axis=(2, 3)).transpose(2, 3, 0, 1)    # HWIO, flipped
        y = jax.lax.conv_general_dilated(
            y, wc, window_strides=(1, 1), padding=((1, 2), (1, 2)),
            lhs_dilation=(2, 2),
            dimension_numbers=("NHWC", "HWIO", "NHWC")) + b
        y = jnp.maximum(y, 0.0) if act == "relu" else jnp.tanh(jax.nn.sigmoid(y))
    return y.reshape(B, 28 * 28)


if __name__ == "__main__":
    key = jax.random.PRNGKey(0)
    k_params, k_x = jax.random.split(key)
    net = ActionNetworkPallas(k_params)

    h_t = jax.random.normal(k_x, (2, 256), jnp.float32)

    out = jax.block_until_ready(net.forward(h_t))
    assert out.shape == (2, 28 * 28), out.shape

    ref = jax.block_until_ready(ref_forward(h_t, net))
    max_err = float(jnp.max(jnp.abs(out - ref)))
    # bf16 matmul weights with f32 accumulation: tolerance loosened vs f32 kernel.
    assert max_err < 2e-2, f"max_err={max_err}"

    print("KERNEL_OK")
</pallas_src>

<mosaic_0001>
module attributes {stable_mosaic.version = 11 : i64} {
  func.func @decoder_kernel(%arg0: i32, %arg1: memref<2x256xf32, #tpu.memory_space<vmem>>, %arg2: memref<256x1792xbf16, #tpu.memory_space<vmem>>, %arg3: memref<1x1792xf32, #tpu.memory_space<vmem>>, %arg4: memref<512x512xbf16, #tpu.memory_space<vmem>>, %arg5: memref<1x512xf32, #tpu.memory_space<vmem>>, %arg6: memref<512x56xbf16, #tpu.memory_space<vmem>>, %arg7: memref<1x56xf32, #tpu.memory_space<vmem>>, %arg8: memref<2x784xf32, #tpu.memory_space<vmem>>) attributes {dimension_semantics = [#tpu.dimension_semantics<parallel>], iteration_bounds = array<i64: 1>, scalar_prefetch = 0 : i64, scratch_operands = 0 : i64, tpu.core_type = #tpu.core_type<tc>, window_params = [{transform_indices = @transform_0, window_bounds = array<i64: 2, 256>}, {pipeline_mode = #tpu.pipeline_mode<synchronous>, transform_indices = @transform_1, window_bounds = array<i64: 256, 1792>}, {pipeline_mode = #tpu.pipeline_mode<synchronous>, transform_indices = @transform_2, window_bounds = array<i64: 1, 1792>}, {pipeline_mode = #tpu.pipeline_mode<synchronous>, transform_indices = @transform_3, window_bounds = array<i64: 512, 512>}, {pipeline_mode = #tpu.pipeline_mode<synchronous>, transform_indices = @transform_4, window_bounds = array<i64: 1, 512>}, {pipeline_mode = #tpu.pipeline_mode<synchronous>, transform_indices = @transform_5, window_bounds = array<i64: 512, 56>}, {pipeline_mode = #tpu.pipeline_mode<synchronous>, transform_indices = @transform_6, window_bounds = array<i64: 1, 56>}, {transform_indices = @transform_7, window_bounds = array<i64: 2, 784>}]} {
    %c0 = arith.constant 0 : index
    %c0_0 = arith.constant 0 : index
    %0 = vector.load %arg1[%c0, %c0_0] : memref<2x256xf32, #tpu.memory_space<vmem>>, vector<2x256xf32>
    %1 = arith.truncf %0 : vector<2x256xf32> to vector<2x256xbf16>
    %c0_1 = arith.constant 0 : index
    %c0_2 = arith.constant 0 : index
    %2 = vector.load %arg2[%c0_1, %c0_2] : memref<256x1792xbf16, #tpu.memory_space<vmem>>, vector<256x1792xbf16>
    %cst = arith.constant dense<0.000000e+00> : vector<2x1792xf32>
    %3 = tpu.matmul %1, %2, %cst {dimension_numbers = #tpu.dot_dimension_numbers<[1], [0], [0], [1], [0, 0, 1, 1], [], []>} : vector<2x256xbf16>, vector<256x1792xbf16>, vector<2x1792xf32> -> vector<2x1792xf32>
    %c0_3 = arith.constant 0 : index
    %c0_4 = arith.constant 0 : index
    %4 = vector.load %arg3[%c0_3, %c0_4] : memref<1x1792xf32, #tpu.memory_space<vmem>>, vector<1x1792xf32>
    %5 = vector.broadcast %4 : vector<1x1792xf32> to vector<2x1792xf32>
    %6 = arith.addf %3, %5 : vector<2x1792xf32>
    %cst_5 = arith.constant 0.000000e+00 : f32
    %7 = vector.broadcast %cst_5 : f32 to vector<2x1792xf32>
    %8 = arith.maximumf %6, %7 : vector<2x1792xf32>
    %9 = vector.shape_cast %8 : vector<2x1792xf32> to vector<2x7x256xf32>
    %10 = vector.extract_strided_slice %9 {offsets = [0, 1, 0], sizes = [2, 6, 256], strides = [1, 1, 1]} : vector<2x7x256xf32> to vector<2x6x256xf32>
    %cst_6 = arith.constant 0.000000e+00 : f32
    %11 = vector.broadcast %cst_6 : f32 to vector<2x1x256xf32>
    %12 = tpu.concatenate %10, %11 in 1 : vector<2x6x256xf32>, vector<2x1x256xf32> -> vector<2x7x256xf32>
    %13 = tpu.concatenate %9, %12 in 2 : vector<2x7x256xf32>, vector<2x7x256xf32> -> vector<2x7x512xf32>
    %14 = arith.truncf %13 : vector<2x7x512xf32> to vector<2x7x512xbf16>
    %15 = vector.shape_cast %14 : vector<2x7x512xbf16> to vector<14x512xbf16>
    %c0_7 = arith.constant 0 : index
    %c0_8 = arith.constant 0 : index
    %16 = vector.load %arg4[%c0_7, %c0_8] : memref<512x512xbf16, #tpu.memory_space<vmem>>, vector<512x512xbf16>
    %cst_9 = arith.constant dense<0.000000e+00> : vector<14x512xf32>
    %17 = tpu.matmul %15, %16, %cst_9 {dimension_numbers = #tpu.dot_dimension_numbers<[1], [0], [0], [1], [0, 0, 1, 1], [], []>} : vector<14x512xbf16>, vector<512x512xbf16>, vector<14x512xf32> -> vector<14x512xf32>
    %c0_10 = arith.constant 0 : index
    %c0_11 = arith.constant 0 : index
    %18 = vector.load %arg5[%c0_10, %c0_11] : memref<1x512xf32, #tpu.memory_space<vmem>>, vector<1x512xf32>
    %19 = vector.broadcast %18 : vector<1x512xf32> to vector<14x512xf32>
    %20 = arith.addf %17, %19 : vector<14x512xf32>
    %21 = vector.shape_cast %20 : vector<14x512xf32> to vector<2x7x512xf32>
    %cst_12 = arith.constant 0.000000e+00 : f32
    %22 = vector.broadcast %cst_12 : f32 to vector<2x7x512xf32>
    %23 = arith.maximumf %21, %22 : vector<2x7x512xf32>
    %24 = vector.shape_cast %23 : vector<2x7x512xf32> to vector<2x14x256xf32>
    %25 = vector.extract_strided_slice %24 {offsets = [0, 1, 0], sizes = [2, 13, 256], strides = [1, 1, 1]} : vector<2x14x256xf32> to vector<2x13x256xf32>
    %cst_13 = arith.constant 0.000000e+00 : f32
    %26 = vector.broadcast %cst_13 : f32 to vector<2x1x256xf32>
    %27 = tpu.concatenate %25, %26 in 1 : vector<2x13x256xf32>, vector<2x1x256xf32> -> vector<2x14x256xf32>
    %28 = tpu.concatenate %24, %27 in 2 : vector<2x14x256xf32>, vector<2x14x256xf32> -> vector<2x14x512xf32>
    %29 = arith.truncf %28 : vector<2x14x512xf32> to vector<2x14x512xbf16>
    %30 = vector.shape_cast %29 : vector<2x14x512xbf16> to vector<28x512xbf16>
    %c0_14 = arith.constant 0 : index
    %c0_15 = arith.constant 0 : index
    %31 = vector.load %arg6[%c0_14, %c0_15] : memref<512x56xbf16, #tpu.memory_space<vmem>>, vector<512x56xbf16>
    %cst_16 = arith.constant dense<0.000000e+00> : vector<28x56xf32>
    %32 = tpu.matmul %30, %31, %cst_16 {dimension_numbers = #tpu.dot_dimension_numbers<[1], [0], [0], [1], [0, 0, 1, 1], [], []>} : vector<28x512xbf16>, vector<512x56xbf16>, vector<28x56xf32> -> vector<28x56xf32>
    %c0_17 = arith.constant 0 : index
    %c0_18 = arith.constant 0 : index
    %33 = vector.load %arg7[%c0_17, %c0_18] : memref<1x56xf32, #tpu.memory_space<vmem>>, vector<1x56xf32>
    %34 = vector.broadcast %33 : vector<1x56xf32> to vector<28x56xf32>
    %35 = arith.addf %32, %34 : vector<28x56xf32>
    %36 = vector.shape_cast %35 : vector<28x56xf32> to vector<2x14x56xf32>
    %37 = arith.negf %36 : vector<2x14x56xf32>
    %38 = math.exp %37 : vector<2x14x56xf32>
    %cst_19 = arith.constant 1.000000e+00 : f32
    %39 = vector.broadcast %cst_19 : f32 to vector<2x14x56xf32>
    %40 = arith.addf %39, %38 : vector<2x14x56xf32>
    %41 = arith.divf %39, %40 : vector<2x14x56xf32>
    %42 = math.tanh %41 : vector<2x14x56xf32>
    %43 = vector.shape_cast %42 : vector<2x14x56xf32> to vector<2x784xf32>
    %c0_20 = arith.constant 0 : index
    %c0_21 = arith.constant 0 : index
    %44 = vector.load %arg8[%c0_20, %c0_21] : memref<2x784xf32, #tpu.memory_space<vmem>>, vector<2x784xf32>
    tpu.vector_store %arg8[%c0_20, %c0_21], %43 {strides = array<i32>} : memref<2x784xf32, #tpu.memory_space<vmem>>, vector<2x784xf32>,
    return
  }
  func.func @transform_0(%arg0: i32) -> (i32, i32) {
    %c0_i32 = arith.constant 0 : i32
    %c0_i32_0 = arith.constant 0 : i32
    return %arg0, %c0_i32 : i32, i32
  }
  func.func @transform_1(%arg0: i32) -> (i32, i32) {
    %c0_i32 = arith.constant 0 : i32
    %c0_i32_0 = arith.constant 0 : i32
    %c0_i32_1 = arith.constant 0 : i32
    return %c0_i32, %c0_i32_0 : i32, i32
  }
  func.func @transform_2(%arg0: i32) -> (i32, i32) {
    %c0_i32 = arith.constant 0 : i32
    %c0_i32_0 = arith.constant 0 : i32
    %c0_i32_1 = arith.constant 0 : i32
    return %c0_i32, %c0_i32_0 : i32, i32
  }
  func.func @transform_3(%arg0: i32) -> (i32, i32) {
    %c0_i32 = arith.constant 0 : i32
    %c0_i32_0 = arith.constant 0 : i32
    %c0_i32_1 = arith.constant 0 : i32
    return %c0_i32, %c0_i32_0 : i32, i32
  }
  func.func @transform_4(%arg0: i32) -> (i32, i32) {
    %c0_i32 = arith.constant 0 : i32
    %c0_i32_0 = arith.constant 0 : i32
    %c0_i32_1 = arith.constant 0 : i32
    return %c0_i32, %c0_i32_0 : i32, i32
  }
  func.func @transform_5(%arg0: i32) -> (i32, i32) {
    %c0_i32 = arith.constant 0 : i32
    %c0_i32_0 = arith.constant 0 : i32
    %c0_i32_1 = arith.constant 0 : i32
    return %c0_i32, %c0_i32_0 : i32, i32
  }
  func.func @transform_6(%arg0: i32) -> (i32, i32) {
    %c0_i32 = arith.constant 0 : i32
    %c0_i32_0 = arith.constant 0 : i32
    %c0_i32_1 = arith.constant 0 : i32
    return %c0_i32, %c0_i32_0 : i32, i32
  }
  func.func @transform_7(%arg0: i32) -> (i32, i32) {
    %c0_i32 = arith.constant 0 : i32
    %c0_i32_0 = arith.constant 0 : i32
    return %arg0, %c0_i32 : i32, i32
  }
}

</mosaic_0001>

<bundles_post_ra>
// kernel: tpu_custom_call.1
= control target key start
LH: loop header
LB: loop body
LE: loop exit
PB: predicated region body
PF: predicated region fallthrough
CT: control target
= control target key end

     0   :  { %12 = vsyncpa [#allocation3], 0  ;;  %s6124_s0 = inlined_call_operand.vmem [shape: f32[2,256], index: 0, kind: input, shape index: {}]   ;;  %s6125_s1 = inlined_call_operand.hbm [shape: bf16[256,1792], index: 1, kind: input, shape index: {}]   ;;  %s6126_s2 = inlined_call_operand.vmem [shape: f32[1,1792], index: 2, kind: input, shape index: {}]   ;;  %s6127_s3 = inlined_call_operand.hbm [shape: bf16[512,512], index: 3, kind: input, shape index: {}]   ;;  %s6128_s4 = inlined_call_operand.vmem [shape: f32[1,512], index: 4, kind: input, shape index: {}]   ;;  %s6129_s5 = inlined_call_operand.vmem [shape: bf16[512,56], index: 5, kind: input, shape index: {}]   ;;  %s6130_s6 = inlined_call_operand.vmem [shape: f32[1,56], index: 6, kind: input, shape index: {}]   ;;  %s6131_s7 = inlined_call_operand.hbm [shape: f32[2,784], index: 7, kind: output, shape index: {}]  }
   0x1   :  { %13 = vsyncpa [#allocation6], 0 }
   0x2   :  { %14 = vsyncpa [#allocation4], 0  ;;  %s5712_s24 = smov [#allocation2]  }
   0x3   :  { %s22_s25 = sshll.u32 %s5712_s24, 4  ;;  %s23_s25 = int_to_ptr.vmem [resolvable:$true] %s22_s25 }
   0x4   :  { %s5654_s26 = scalar_lea.vmem %s23_s25, 28672  ;;  %p5659_p1 = scmp.lt.s32.totalorder %s23_s25, %s23_s25 }
   0x5   :  { %p5655_p0 = scmp.ne.s32.totalorder %s23_s25, %s5654_s26  ;;  %p5660_p2 = scmp.lt.s32.totalorder %s5654_s26, %s5654_s26 }
   0x7   :  { %p5661_p3 = por %p5660_p2, %p5659_p1 }
   0x9   :  { %p5662_p4 = pnand %p5661_p3, %p5655_p0 }
   0xb   :  { %5665 = shalt.err (!%p5662_p4)
}
   0xc   :  { %s5713_s27 = smov 896   ;;  %s5714_s28 = smov 56  }
   0xd   :  { %28 = dma.hbm_to_vmem [thread:$0]  %s6125_s1, 28672, %s23_s25, [#allocation3], %s5713_s27, %s5713_s27, %s5714_s28  }
   0xe   :  { %s5715_s8 = smov [#allocation5]  }
   0xf   :  { %s36_s9 = sshll.u32 %s5715_s8, 4  ;;  %s37_s9 = int_to_ptr.vmem [resolvable:$true] %s36_s9 }
  0x10   :  { %s5674_s10 = scalar_lea.vmem %s37_s9, 16384  ;;  %p5679_p6 = scmp.lt.s32.totalorder %s37_s9, %s37_s9 }
  0x11   :  { %p5675_p5 = scmp.ne.s32.totalorder %s37_s9, %s5674_s10  ;;  %p5680_p7 = scmp.lt.s32.totalorder %s5674_s10, %s5674_s10 }
  0x13   :  { %p5681_p8 = por %p5680_p7, %p5679_p6 }
  0x15   :  { %p5682_p9 = pnand %p5681_p8, %p5675_p5 }
  0x17   :  { %5685 = shalt.err (!%p5682_p9)
}
  0x18   :  { %s5716_s11 = smov 256   ;;  %s5717_s12 = smov 16  }
  0x19   :  { %42 = dma.hbm_to_vmem [thread:$0]  %s6127_s3, 16384, %s37_s9, [#allocation6], %s5716_s11, %s5716_s11, %s5717_s12  }
  0x1a   :  { %5706 = dma.done.wait [#allocation3], 28672  }
  0x1b   :  { %5707 = vsyncadd [#allocation3], 4294938624 }
  0x1c   :  { %5708 = dma.done.wait [#allocation6], 16384  }
  0x1d   :  { %5709 = vsyncadd [#allocation6], 4294950912  ;;  %v5002_v0 = vld [vmem:[#allocation2 + $0x314] ss:$56 sps:$4 sm:$0xff]   ;;  %v5006_v2 = vld [vmem:[#allocation2 + $0x310] ss:$56 sps:$4 sm:$0xff]  }
  0x1e   :  { %v5004_v1 = vld [vmem:[#allocation2 + $0x31c] ss:$56 sps:$4 sm:$0xff]   ;;  %1488 = vmatprep.subr.bf16.mxu0 %v5002_v0  ;;  %v5007_v3 = vld [vmem:[#allocation2 + $0x318] ss:$56 sps:$4 sm:$0xff]   ;;  %v5010_v5 = vld [vmem:[#allocation2 + $0x2ac] ss:$56 sps:$4 sm:$0xff]  }
  0x1f   :  { %1529 = vmatprep.subr.bf16.mxu1 %v5004_v1  ;;  %v5008_v4 = vld [vmem:[#allocation2 + $0x2a4] ss:$56 sps:$4 sm:$0xff]   ;;  %1489 = vmatpush1.bf16.msra.mxu0 %v5006_v2  ;;  %v5012_v6 = vld [vmem:[#allocation2 + $0x2a0] ss:$56 sps:$4 sm:$0xff]   ;;  %v5014_v8 = vld [vmem:[#allocation2 + $0x234] ss:$56 sps:$4 sm:$0xff]  }
  0x20   :  { %1530 = vmatpush1.bf16.msra.mxu1 %v5007_v3  ;;  %1490 = vmatprep.subr.bf16.mxu0 %v5008_v4  ;;  %v5013_v7 = vld [vmem:[#allocation2 + $0x2a8] ss:$56 sps:$4 sm:$0xff]   ;;  %v5016_v9 = vld [vmem:[#allocation2 + $0x23c] ss:$56 sps:$4 sm:$0xff]   ;;  %v5019_v11 = vld [vmem:[#allocation2 + $0x238] ss:$56 sps:$4 sm:$0xff]  }
  0x21   :  { %1531 = vmatprep.subr.bf16.mxu1 %v5010_v5  ;;  %v5018_v10 = vld [vmem:[#allocation2 + $0x230] ss:$56 sps:$4 sm:$0xff]   ;;  %v5020_v12 = vld [vmem:[#allocation2 + $0x1c4] ss:$56 sps:$4 sm:$0xff]   ;;  %v5024_v14 = vld [vmem:[#allocation2 + $0x1c0] ss:$56 sps:$4 sm:$0xff]  }
  0x22   :  { %v5022_v13 = vld [vmem:[#allocation2 + $0x1cc] ss:$56 sps:$4 sm:$0xff]   ;;  %v5025_v15 = vld [vmem:[#allocation2 + $0x1c8] ss:$56 sps:$4 sm:$0xff]   ;;  %v5028_v17 = vld [vmem:[#allocation2 + $0x15c] ss:$56 sps:$4 sm:$0xff]  }
  0x23   :  { %1491 = vmatpush1.bf16.msra.mxu0 %v5012_v6  ;;  %v5026_v16 = vld [vmem:[#allocation2 + $0x154] ss:$56 sps:$4 sm:$0xff]   ;;  %v5030_v18 = vld [vmem:[#allocation2 + $0x150] ss:$56 sps:$4 sm:$0xff]   ;;  %v5032_v20 = vld [vmem:[#allocation2 + $0xe4] ss:$56 sps:$4 sm:$0xff]  }
  0x24   :  { %1532 = vmatpush1.bf16.msra.mxu1 %v5013_v7  ;;  %1492 = vmatprep.subr.bf16.mxu0 %v5014_v8  ;;  %v5031_v19 = vld [vmem:[#allocation2 + $0x158] ss:$56 sps:$4 sm:$0xff]   ;;  %v5034_v21 = vld [vmem:[#allocation2 + $0xec] ss:$56 sps:$4 sm:$0xff]   ;;  %v5037_v23 = vld [vmem:[#allocation2 + $0xe8] ss:$56 sps:$4 sm:$0xff]  }
  0x25   :  { %1533 = vmatprep.subr.bf16.mxu1 %v5016_v9  ;;  %v5036_v22 = vld [vmem:[#allocation2 + $0xe0] ss:$56 sps:$4 sm:$0xff]   ;;  %v5038_v24 = vld [vmem:[#allocation2 + $0x74] ss:$56 sps:$4 sm:$0xff]   ;;  %v5042_v26 = vld [vmem:[#allocation2 + $0x70] ss:$56 sps:$4 sm:$0xff]  }
  0x26   :  { %v5040_v25 = vld [vmem:[#allocation2 + $0x7c] ss:$56 sps:$4 sm:$0xff]   ;;  %v5043_v27 = vld [vmem:[#allocation2 + $0x78] ss:$56 sps:$4 sm:$0xff]   ;;  %v5046_v29 = vld [vmem:[#allocation2 + $0xc] ss:$56 sps:$4 sm:$0xff]  }
  0x27   :  { %1493 = vmatpush1.bf16.msra.mxu0 %v5018_v10  ;;  %v5044_v28 = vld [vmem:[#allocation2 + $0x4] ss:$56 sps:$4 sm:$0xff]   ;;  %v5048_v30 = vld [vmem:[#allocation2] ss:$56 sps:$4 sm:$0xff]   ;;  %v5050_v32 = vld [vmem:[#allocation2 + $0x694] ss:$56 sps:$4 sm:$0xff]  }
  0x28   :  { %1534 = vmatpush1.bf16.msra.mxu1 %v5019_v11  ;;  %1494 = vmatprep.subr.bf16.mxu0 %v5020_v12  ;;  %v5049_v31 = vld [vmem:[#allocation2 + $0x8] ss:$56 sps:$4 sm:$0xff]   ;;  %v5052_v33 = vld [vmem:[#allocation2 + $0x69c] ss:$56 sps:$4 sm:$0xff]   ;;  %v5055_v35 = vld [vmem:[#allocation2 + $0x698] ss:$56 sps:$4 sm:$0xff]  }
  0x29   :  { %1535 = vmatprep.subr.bf16.mxu1 %v5022_v13  ;;  %v5054_v34 = vld [vmem:[#allocation2 + $0x690] ss:$56 sps:$4 sm:$0xff]   ;;  %v5056_v36 = vld [vmem:[#allocation2 + $0x624] ss:$56 sps:$4 sm:$0xff]   ;;  %v5060_v38 = vld [vmem:[#allocation2 + $0x620] ss:$56 sps:$4 sm:$0xff]  }
  0x2a   :  { %v5058_v37 = vld [vmem:[#allocation2 + $0x62c] ss:$56 sps:$4 sm:$0xff]   ;;  %v5061_v39 = vld [vmem:[#allocation2 + $0x628] ss:$56 sps:$4 sm:$0xff]   ;;  %v5064_v41 = vld [vmem:[#allocation2 + $0x5bc] ss:$56 sps:$4 sm:$0xff]  }
  0x2b   :  { %1495 = vmatpush1.bf16.msra.mxu0 %v5024_v14  ;;  %v5062_v40 = vld [vmem:[#allocation2 + $0x5b4] ss:$56 sps:$4 sm:$0xff]   ;;  %v5066_v42 = vld [vmem:[#allocation2 + $0x5b0] ss:$56 sps:$4 sm:$0xff]   ;;  %v5068_v44 = vld [vmem:[#allocation2 + $0x544] ss:$56 sps:$4 sm:$0xff]  }
  0x2c   :  { %1536 = vmatpush1.bf16.msra.mxu1 %v5025_v15  ;;  %1496 = vmatprep.subr.bf16.mxu0 %v5026_v16  ;;  %v5067_v43 = vld [vmem:[#allocation2 + $0x5b8] ss:$56 sps:$4 sm:$0xff]   ;;  %v5070_v45 = vld [vmem:[#allocation2 + $0x54c] ss:$56 sps:$4 sm:$0xff]   ;;  %v5073_v48 = vld [vmem:[#allocation2 + $0x548] ss:$56 sps:$4 sm:$0xff]  }
  0x2d   :  { %1537 = vmatprep.subr.bf16.mxu1 %v5028_v17  ;;  %v4505_v46 = vld.sshfl [vmem:[%s6124_s0] sm:$0x33 pattern:$0x76325410]  ;;  %v5074_v50 = vld [vmem:[#allocation2 + $0x4d4] ss:$56 sps:$4 sm:$0xff]  }
  0x2e   :  { %v5072_v47 = vld [vmem:[#allocation2 + $0x540] ss:$56 sps:$4 sm:$0xff]   ;;  %v65_v49 = vcombine.high %v4505_v46, %v4505_v46  ;;  %v5076_v51 = vld [vmem:[#allocation2 + $0x4dc] ss:$56 sps:$4 sm:$0xff]   ;;  %v5078_v53 = vld [vmem:[#allocation2 + $0x4d0] ss:$56 sps:$4 sm:$0xff]   ;;  %v5790_v5 = vpack.c.bf16 %v4505_v46, %v4505_v46 }
  0x2f   :  { %1497 = vmatpush1.bf16.msra.mxu0 %v5030_v18  ;;  %v5079_v54 = vld [vmem:[#allocation2 + $0x4d8] ss:$56 sps:$4 sm:$0xff]   ;;  %v5080_v55 = vld [vmem:[#allocation2 + $0x464] ss:$56 sps:$4 sm:$0xff]   ;;  %v5085_v58 = vld [vmem:[#allocation2 + $0x468] ss:$56 sps:$4 sm:$0xff]  }
  0x30   :  { %1538 = vmatpush1.bf16.msra.mxu1 %v5031_v19  ;;  %1498 = vmatprep.subr.bf16.mxu0 %v5032_v20  ;;  %v5786_v52 = vpack.c.bf16 %v65_v49, %v65_v49  ;;  %v5082_v56 = vld [vmem:[#allocation2 + $0x46c] ss:$56 sps:$4 sm:$0xff]   ;;  %v5084_v57 = vld [vmem:[#allocation2 + $0x460] ss:$56 sps:$4 sm:$0xff]   ;;  %v5088_v60 = vld [vmem:[#allocation2 + $0x3fc] ss:$56 sps:$4 sm:$0xff]  }
  0x31   :  { %1539 = vmatprep.subr.bf16.mxu1 %v5034_v21  ;;  %v5086_v59 = vld [vmem:[#allocation2 + $0x3f4] ss:$56 sps:$4 sm:$0xff]   ;;  %v5090_v61 = vld [vmem:[#allocation2 + $0x3f0] ss:$56 sps:$4 sm:$0xff]   ;;  %v5092_v63 = vld [vmem:[#allocation2 + $0x384] ss:$56 sps:$4 sm:$0xff]  }
  0x32   :  { %1520 = vmatprep.mubr.bf16.mxu0 %v5786_v52  ;;  %1561 = vmatprep.mubr.bf16.mxu1 %v5786_v52  ;;  %v5091_v62 = vld [vmem:[#allocation2 + $0x3f8] ss:$56 sps:$4 sm:$0xff]   ;;  %v5094_v0 = vld [vmem:[#allocation2 + $0x38c] ss:$56 sps:$4 sm:$0xff]   ;;  %v5097_v2 = vld [vmem:[#allocation2 + $0x388] ss:$56 sps:$4 sm:$0xff]  }
  0x33   :  { %1499 = vmatpush1.bf16.msra.mxu0 %v5036_v22  ;;  %v5096_v1 = vld [vmem:[#allocation2 + $0x380] ss:$56 sps:$4 sm:$0xff]   ;;  %v5100_v3 = vld [vmem:[#allocation2 + $0x324] ss:$56 sps:$4 sm:$0xff]   ;;  %v5106_v8 = vld [vmem:[#allocation2 + $0x2b4] ss:$56 sps:$4 sm:$0xff]  }
  0x34   :  { %1540 = vmatpush1.bf16.msra.mxu1 %v5037_v23  ;;  %1500 = vmatprep.subr.bf16.mxu0 %v5038_v24  ;;  %v5103_v4 = vld [vmem:[#allocation2 + $0x32c] ss:$56 sps:$4 sm:$0xff]   ;;  %v5098_v6 = vld [vmem:[#allocation2 + $0x320] ss:$56 sps:$4 sm:$0xff]   ;;  %v5109_v9 = vld [vmem:[#allocation2 + $0x2bc] ss:$56 sps:$4 sm:$0xff]  }
  0x35   :  { %1541 = vmatprep.subr.bf16.mxu1 %v5040_v25  ;;  %v5101_v7 = vld [vmem:[#allocation2 + $0x328] ss:$56 sps:$4 sm:$0xff]   ;;  %v5107_v11 = vld [vmem:[#allocation2 + $0x2b8] ss:$56 sps:$4 sm:$0xff]   ;;  %v5112_v12 = vld [vmem:[#allocation2 + $0x244] ss:$56 sps:$4 sm:$0xff]  }
  0x36   :  { %v5104_v10 = vld [vmem:[#allocation2 + $0x2b0] ss:$56 sps:$4 sm:$0xff]   ;;  %v5115_v13 = vld [vmem:[#allocation2 + $0x24c] ss:$56 sps:$4 sm:$0xff]   ;;  %v5110_v14 = vld [vmem:[#allocation2 + $0x240] ss:$56 sps:$4 sm:$0xff]  }
  0x37   :  { %1501 = vmatpush1.bf16.msra.mxu0 %v5042_v26  ;;  %v5113_v15 = vld [vmem:[#allocation2 + $0x248] ss:$56 sps:$4 sm:$0xff]   ;;  %v5118_v16 = vld [vmem:[#allocation2 + $0x1d4] ss:$56 sps:$4 sm:$0xff]   ;;  %v5119_v19 = vld [vmem:[#allocation2 + $0x1d8] ss:$56 sps:$4 sm:$0xff]  }
  0x38   :  { %1542 = vmatpush1.bf16.msra.mxu1 %v5043_v27  ;;  %1502 = vmatprep.subr.bf16.mxu0 %v5044_v28  ;;  %v5121_v17 = vld [vmem:[#allocation2 + $0x1dc] ss:$56 sps:$4 sm:$0xff]   ;;  %v5116_v18 = vld [vmem:[#allocation2 + $0x1d0] ss:$56 sps:$4 sm:$0xff]   ;;  %v5127_v21 = vld [vmem:[#allocation2 + $0x16c] ss:$56 sps:$4 sm:$0xff]  }
  0x39   :  { %1543 = vmatprep.subr.bf16.mxu1 %v5046_v29  ;;  %v5124_v20 = vld [vmem:[#allocation2 + $0x164] ss:$56 sps:$4 sm:$0xff]   ;;  %v5122_v22 = vld [vmem:[#allocation2 + $0x160] ss:$56 sps:$4 sm:$0xff]   ;;  %v5130_v24 = vld [vmem:[#allocation2 + $0xf4] ss:$56 sps:$4 sm:$0xff]  }
  0x3a   :  { %v5125_v23 = vld [vmem:[#allocation2 + $0x168] ss:$56 sps:$4 sm:$0xff]   ;;  %v5133_v25 = vld [vmem:[#allocation2 + $0xfc] ss:$56 sps:$4 sm:$0xff]   ;;  %v5131_v27 = vld [vmem:[#allocation2 + $0xf8] ss:$56 sps:$4 sm:$0xff]  }
  0x3b   :  { %1503 = vmatpush1.bf16.msra.mxu0 %v5048_v30  ;;  %v5128_v26 = vld [vmem:[#allocation2 + $0xf0] ss:$56 sps:$4 sm:$0xff]   ;;  %v5136_v28 = vld [vmem:[#allocation2 + $0x84] ss:$56 sps:$4 sm:$0xff]   ;;  %v5134_v30 = vld [vmem:[#allocation2 + $0x80] ss:$56 sps:$4 sm:$0xff]  }
  0x3c   :  { %1544 = vmatpush1.bf16.msra.mxu1 %v5049_v31  ;;  %1504 = vmatprep.subr.bf16.mxu0 %v5050_v32  ;;  %v5139_v29 = vld [vmem:[#allocation2 + $0x8c] ss:$56 sps:$4 sm:$0xff]   ;;  %v5137_v31 = vld [vmem:[#allocation2 + $0x88] ss:$56 sps:$4 sm:$0xff]   ;;  %v5169_v49 = vld [vmem:[#allocation2 + $0x55c] ss:$56 sps:$4 sm:$0xff]  }
  0x3d   :  { %1545 = vmatprep.subr.bf16.mxu1 %v5052_v33  ;;  %v5142_v32 = vld [vmem:[#allocation2 + $0x14] ss:$56 sps:$4 sm:$0xff]   ;;  %v5158_v46 = vld [vmem:[#allocation2 + $0x5c0] ss:$56 sps:$4 sm:$0xff]   ;;  %vm1885_vm0 = vcmask 1045504   ;;  %vm3375_vm1 = vcmask 1044480  }
  0x3e   :  { %v5145_v33 = vld [vmem:[#allocation2 + $0x1c] ss:$56 sps:$4 sm:$0xff]   ;;  %vm3354_vm2 = vcmask 1046528   ;;  %s5725_s9 = smov 40   ;;  %s5726_s10 = smov 96   ;;  %vm4419_vm3 = vcmask 326656  }
  0x3f   :  { %1505 = vmatpush2.bf16.msra.mxu0 %v5054_v34  ;;  %v5140_v34 = vld [vmem:[#allocation2 + $0x10] ss:$56 sps:$4 sm:$0xff]   ;;  %s5728_s11 = smov 64   ;;  %s5729_s12 = smov 24   ;;  %vm4415_vm4 = vcmask 457728   ;;  %vm4421_vm5 = vcmask 785408  }
  0x40   :  { %1546 = vmatpush2.bf16.msra.mxu1 %v5055_v35  ;;  %1506 = vmatprep.subr.bf16.mxu0 %v5056_v36  ;;  %v5143_v35 = vld [vmem:[#allocation2 + $0x18] ss:$56 sps:$4 sm:$0xff]   ;;  %v5148_v36 = vld [vmem:[#allocation2 + $0x6a4] ss:$56 sps:$4 sm:$0xff]   ;;  %s5730_s13 = smov 48   ;;  %s5731_s14 = smov 120  }
  0x41   :  { %1547 = vmatprep.subr.bf16.mxu1 %v5058_v37  ;;  %v5151_v37 = vld [vmem:[#allocation2 + $0x6ac] ss:$56 sps:$4 sm:$0xff]   ;;  %s5732_s1 = smov 32   ;;  %s5733_s3 = smov 104   ;;  %vm4427_vm6 = vcmask 64512   ;;  %vm4423_vm7 = vcmask 195584  }
  0x42   :  { %s5734_s0 = smov 88   ;;  %vm4417_vm8 = vcmask 916480   ;;  %vm4429_vm9 = vcmask 523264   ;;  %vm4425_vm10 = vcmask 654336   ;;  %vm4431_vm11 = vcmask 982016   ;;  %s5735_s15 = smov [#allocation7]  }
  0x43   :  { %1507 = vmatpush2.bf16.msra.mxu0 %v5060_v38  ;;  %v5146_v38 = vld [vmem:[#allocation2 + $0x6a0] ss:$56 sps:$4 sm:$0xff]   ;;  %vm4433_vm12 = vcmask 392192   ;;  %vm4437_vm13 = vcmask 261120   ;;  %vm4435_vm14 = vcmask 850944   ;;  %vm4439_vm15 = vcmask 719872  }
  0x44   :  { %1548 = vmatpush2.bf16.msra.mxu1 %v5061_v39  ;;  %1508 = vmatprep.subr.bf16.mxu0 %v5062_v40  ;;  %v5149_v39 = vld [vmem:[#allocation2 + $0x6a8] ss:$56 sps:$4 sm:$0xff]   ;;  %v5154_v40 = vld [vmem:[#allocation2 + $0x634] ss:$56 sps:$4 sm:$0xff]   ;;  %s4495_s16 = sshll.u32 %s5735_s15, 4  ;;  %s4496_s16 = int_to_ptr.vmem [resolvable:$true] %s4495_s16 }
  0x45   :  { %1549 = vmatprep.subr.bf16.mxu1 %v5064_v41  ;;  %v5157_v41 = vld [vmem:[#allocation2 + $0x63c] ss:$56 sps:$4 sm:$0xff]   ;;  %s5686_s17 = scalar_lea.vmem %s4496_s16, 224  ;;  %p5691_p11 = scmp.lt.s32.totalorder %s4496_s16, %s4496_s16 }
  0x46   :  { %p5687_p10 = scmp.ne.s32.totalorder %s4496_s16, %s5686_s17  ;;  %p5692_p12 = scmp.lt.s32.totalorder %s5686_s17, %s5686_s17 }
  0x47   :  { %1509 = vmatpush2.bf16.msra.mxu0 %v5066_v42  ;;  %v5152_v42 = vld [vmem:[#allocation2 + $0x630] ss:$56 sps:$4 sm:$0xff]  }
  0x48   :  { %1550 = vmatpush2.bf16.msra.mxu1 %v5067_v43  ;;  %1510 = vmatprep.subr.bf16.mxu0 %v5068_v44  ;;  %v5155_v43 = vld [vmem:[#allocation2 + $0x638] ss:$56 sps:$4 sm:$0xff]   ;;  %v5160_v44 = vld [vmem:[#allocation2 + $0x5c4] ss:$56 sps:$4 sm:$0xff]   ;;  %p5693_p13 = por %p5692_p12, %p5691_p11 }
  0x49   :  { %1551 = vmatprep.subr.bf16.mxu1 %v5070_v45  ;;  %v5163_v45 = vld [vmem:[#allocation2 + $0x5cc] ss:$56 sps:$4 sm:$0xff]  }
  0x4a   :  { %p5694_p0 = pnand %p5693_p13, %p5687_p10 }
  0x4b   :  { %1511 = vmatpush2.bf16.msra.mxu0 %v5072_v47  ;;  %v5161_v47 = vld [vmem:[#allocation2 + $0x5c8] ss:$56 sps:$4 sm:$0xff]  }
  0x4c   :  { %1552 = vmatpush2.bf16.msra.mxu1 %v5073_v48  ;;  %1512 = vmatprep.subr.bf16.mxu0 %v5074_v50  ;;  %v5166_v48 = vld [vmem:[#allocation2 + $0x554] ss:$56 sps:$4 sm:$0xff]   ;;  %v5164_v50 = vld [vmem:[#allocation2 + $0x550] ss:$56 sps:$4 sm:$0xff]  }
  0x4d   :  { %1553 = vmatprep.subr.bf16.mxu1 %v5076_v51  ;;  %v5167_v51 = vld [vmem:[#allocation2 + $0x558] ss:$56 sps:$4 sm:$0xff]  }
  0x4f   :  { %1513 = vmatpush2.bf16.msra.mxu0 %v5078_v53  ;;  %v5172_v53 = vld [vmem:[#allocation2 + $0x4e4] ss:$56 sps:$4 sm:$0xff]  }
  0x50   :  { %1554 = vmatpush2.bf16.msra.mxu1 %v5079_v54  ;;  %1514 = vmatprep.subr.bf16.mxu0 %v5080_v55  ;;  %v5175_v54 = vld [vmem:[#allocation2 + $0x4ec] ss:$56 sps:$4 sm:$0xff]   ;;  %v5170_v55 = vld [vmem:[#allocation2 + $0x4e0] ss:$56 sps:$4 sm:$0xff]  }
  0x51   :  { %1555 = vmatprep.subr.bf16.mxu1 %v5082_v56  ;;  %v5173_v56 = vld [vmem:[#allocation2 + $0x4e8] ss:$56 sps:$4 sm:$0xff]  }
  0x53   :  { %1515 = vmatpush2.bf16.msra.mxu0 %v5084_v57  ;;  %v5178_v57 = vld [vmem:[#allocation2 + $0x474] ss:$56 sps:$4 sm:$0xff]  }
  0x54   :  { %1556 = vmatpush2.bf16.msra.mxu1 %v5085_v58  ;;  %1516 = vmatprep.subr.bf16.mxu0 %v5086_v59  ;;  %v5181_v58 = vld [vmem:[#allocation2 + $0x47c] ss:$56 sps:$4 sm:$0xff]   ;;  %v5176_v59 = vld [vmem:[#allocation2 + $0x470] ss:$56 sps:$4 sm:$0xff]  }
  0x55   :  { %1557 = vmatprep.subr.bf16.mxu1 %v5088_v60  ;;  %v5179_v60 = vld [vmem:[#allocation2 + $0x478] ss:$56 sps:$4 sm:$0xff]  }
  0x57   :  { %1517 = vmatpush2.bf16.msra.mxu0 %v5090_v61  ;;  %v5184_v61 = vld [vmem:[#allocation2 + $0x404] ss:$56 sps:$4 sm:$0xff]  }
  0x58   :  { %1558 = vmatpush2.bf16.msra.mxu1 %v5091_v62  ;;  %1518 = vmatprep.subr.bf16.mxu0 %v5092_v63  ;;  %v5187_v62 = vld [vmem:[#allocation2 + $0x40c] ss:$56 sps:$4 sm:$0xff]   ;;  %v5182_v63 = vld [vmem:[#allocation2 + $0x400] ss:$56 sps:$4 sm:$0xff]  }
  0x59   :  { %1559 = vmatprep.subr.bf16.mxu1 %v5094_v0  ;;  %v5185_v0 = vld [vmem:[#allocation2 + $0x408] ss:$56 sps:$4 sm:$0xff]  }
  0x5b   :  { %1519 = vmatpush2.bf16.msra.mxu0 %v5096_v1  ;;  %v5190_v1 = vld [vmem:[#allocation2 + $0x394] ss:$56 sps:$4 sm:$0xff]  }
  0x5c   :  { %1560 = vmatpush2.bf16.msra.mxu1 %v5097_v2  ;;  %1570 = vmatprep.subr.bf16.mxu0 %v5100_v3  ;;  %v5193_v2 = vld [vmem:[#allocation2 + $0x39c] ss:$56 sps:$4 sm:$0xff]   ;;  %v5188_v3 = vld [vmem:[#allocation2 + $0x390] ss:$56 sps:$4 sm:$0xff]  }
  0x5d   :  { %1611 = vmatprep.subr.bf16.mxu1 %v5103_v4  ;;  %v5191_v4 = vld [vmem:[#allocation2 + $0x398] ss:$56 sps:$4 sm:$0xff]  }
  0x5e   :  { %1521 = vmatmul.mubr.bf16.vlgmr.msra.gmra.mxu0 %v5790_v5 }
  0x5f   :  { %1562 = vmatmul.mubr.bf16.vlgmr.msra.gmra.mxu1 %v5790_v5  ;;  %1571 = vmatpush1.bf16.msra.mxu0 %v5098_v6  ;;  %v5196_v6 = vld [vmem:[#allocation2 + $0x334] ss:$56 sps:$4 sm:$0xff]  }
  0x60   :  { %1612 = vmatpush1.bf16.msra.mxu1 %v5101_v7  ;;  %1572 = vmatprep.subr.bf16.mxu0 %v5106_v8  ;;  %v5244_v7 = vld [vmem:[#allocation2 + $0x33c] ss:$56 sps:$4 sm:$0xff]   ;;  %v5194_v8 = vld [vmem:[#allocation2 + $0x330] ss:$56 sps:$4 sm:$0xff]  }
  0x61   :  { %1613 = vmatprep.subr.bf16.mxu1 %v5109_v9  ;;  %1602 = vmatprep.mubr.bf16.mxu0 %v5786_v52  ;;  %v5199_v9 = vld [vmem:[#allocation2 + $0x2c4] ss:$56 sps:$4 sm:$0xff]  }
  0x62   :  { %1643 = vmatprep.mubr.bf16.mxu1 %v5786_v52 }
  0x63   :  { %1573 = vmatpush1.bf16.msra.mxu0 %v5104_v10  ;;  %v5242_v10 = vld [vmem:[#allocation2 + $0x338] ss:$56 sps:$4 sm:$0xff]  }
  0x64   :  { %1614 = vmatpush1.bf16.msra.mxu1 %v5107_v11  ;;  %1574 = vmatprep.subr.bf16.mxu0 %v5112_v12  ;;  %v5250_v11 = vld [vmem:[#allocation2 + $0x2cc] ss:$56 sps:$4 sm:$0xff]   ;;  %v5197_v12 = vld [vmem:[#allocation2 + $0x2c0] ss:$56 sps:$4 sm:$0xff]  }
  0x65   :  { %1615 = vmatprep.subr.bf16.mxu1 %v5115_v13  ;;  %v5202_v13 = vld [vmem:[#allocation2 + $0x254] ss:$56 sps:$4 sm:$0xff]  }
  0x67   :  { %1575 = vmatpush1.bf16.msra.mxu0 %v5110_v14  ;;  %v5248_v14 = vld [vmem:[#allocation2 + $0x2c8] ss:$56 sps:$4 sm:$0xff]  }
  0x68   :  { %1616 = vmatpush1.bf16.msra.mxu1 %v5113_v15  ;;  %1576 = vmatprep.subr.bf16.mxu0 %v5118_v16  ;;  %v5256_v15 = vld [vmem:[#allocation2 + $0x25c] ss:$56 sps:$4 sm:$0xff]   ;;  %v5200_v16 = vld [vmem:[#allocation2 + $0x250] ss:$56 sps:$4 sm:$0xff]  }
  0x69   :  { %1617 = vmatprep.subr.bf16.mxu1 %v5121_v17  ;;  %v5205_v17 = vld [vmem:[#allocation2 + $0x1e4] ss:$56 sps:$4 sm:$0xff]  }
  0x6b   :  { %1577 = vmatpush1.bf16.msra.mxu0 %v5116_v18  ;;  %v5254_v18 = vld [vmem:[#allocation2 + $0x258] ss:$56 sps:$4 sm:$0xff]  }
  0x6c   :  { %1618 = vmatpush1.bf16.msra.mxu1 %v5119_v19  ;;  %1578 = vmatprep.subr.bf16.mxu0 %v5124_v20  ;;  %v5262_v19 = vld [vmem:[#allocation2 + $0x1ec] ss:$56 sps:$4 sm:$0xff]   ;;  %v5203_v20 = vld [vmem:[#allocation2 + $0x1e0] ss:$56 sps:$4 sm:$0xff]  }
  0x6d   :  { %1619 = vmatprep.subr.bf16.mxu1 %v5127_v21  ;;  %v5208_v21 = vld [vmem:[#allocation2 + $0x174] ss:$56 sps:$4 sm:$0xff]  }
  0x6f   :  { %1579 = vmatpush1.bf16.msra.mxu0 %v5122_v22  ;;  %v5260_v22 = vld [vmem:[#allocation2 + $0x1e8] ss:$56 sps:$4 sm:$0xff]  }
  0x70   :  { %1620 = vmatpush1.bf16.msra.mxu1 %v5125_v23  ;;  %1580 = vmatprep.subr.bf16.mxu0 %v5130_v24  ;;  %v5268_v23 = vld [vmem:[#allocation2 + $0x17c] ss:$56 sps:$4 sm:$0xff]   ;;  %v5206_v24 = vld [vmem:[#allocation2 + $0x170] ss:$56 sps:$4 sm:$0xff]  }
  0x71   :  { %1621 = vmatprep.subr.bf16.mxu1 %v5133_v25  ;;  %v5211_v25 = vld [vmem:[#allocation2 + $0x104] ss:$56 sps:$4 sm:$0xff]  }
  0x73   :  { %1581 = vmatpush1.bf16.msra.mxu0 %v5128_v26  ;;  %v5266_v26 = vld [vmem:[#allocation2 + $0x178] ss:$56 sps:$4 sm:$0xff]  }
  0x74   :  { %1622 = vmatpush1.bf16.msra.mxu1 %v5131_v27  ;;  %1582 = vmatprep.subr.bf16.mxu0 %v5136_v28  ;;  %v5274_v27 = vld [vmem:[#allocation2 + $0x10c] ss:$56 sps:$4 sm:$0xff]   ;;  %v5209_v28 = vld [vmem:[#allocation2 + $0x100] ss:$56 sps:$4 sm:$0xff]  }
  0x75   :  { %1623 = vmatprep.subr.bf16.mxu1 %v5139_v29  ;;  %v5214_v29 = vld [vmem:[#allocation2 + $0x94] ss:$56 sps:$4 sm:$0xff]  }
  0x77   :  { %1583 = vmatpush1.bf16.msra.mxu0 %v5134_v30  ;;  %v5272_v30 = vld [vmem:[#allocation2 + $0x108] ss:$56 sps:$4 sm:$0xff]  }
  0x78   :  { %1624 = vmatpush1.bf16.msra.mxu1 %v5137_v31  ;;  %1584 = vmatprep.subr.bf16.mxu0 %v5142_v32  ;;  %v5280_v31 = vld [vmem:[#allocation2 + $0x9c] ss:$56 sps:$4 sm:$0xff]   ;;  %v5212_v32 = vld [vmem:[#allocation2 + $0x90] ss:$56 sps:$4 sm:$0xff]  }
  0x79   :  { %1625 = vmatprep.subr.bf16.mxu1 %v5145_v33  ;;  %v5217_v33 = vld [vmem:[#allocation2 + $0x24] ss:$56 sps:$4 sm:$0xff]  }
  0x7b   :  { %1585 = vmatpush1.bf16.msra.mxu0 %v5140_v34  ;;  %v5278_v34 = vld [vmem:[#allocation2 + $0x98] ss:$56 sps:$4 sm:$0xff]  }
  0x7c   :  { %1626 = vmatpush1.bf16.msra.mxu1 %v5143_v35  ;;  %1586 = vmatprep.subr.bf16.mxu0 %v5148_v36  ;;  %v5286_v35 = vld [vmem:[#allocation2 + $0x2c] ss:$56 sps:$4 sm:$0xff]   ;;  %v5215_v36 = vld [vmem:[#allocation2 + $0x20] ss:$56 sps:$4 sm:$0xff]  }
  0x7d   :  { %1627 = vmatprep.subr.bf16.mxu1 %v5151_v37  ;;  %v5220_v37 = vld [vmem:[#allocation2 + $0x6b4] ss:$56 sps:$4 sm:$0xff]  }
  0x7f   :  { %1587 = vmatpush2.bf16.msra.mxu0 %v5146_v38  ;;  %v5284_v38 = vld [vmem:[#allocation2 + $0x28] ss:$56 sps:$4 sm:$0xff]  }
  0x80   :  { %1628 = vmatpush2.bf16.msra.mxu1 %v5149_v39  ;;  %1588 = vmatprep.subr.bf16.mxu0 %v5154_v40  ;;  %v5292_v39 = vld [vmem:[#allocation2 + $0x6bc] ss:$56 sps:$4 sm:$0xff]   ;;  %v5218_v40 = vld [vmem:[#allocation2 + $0x6b0] ss:$56 sps:$4 sm:$0xff]  }
  0x81   :  { %1629 = vmatprep.subr.bf16.mxu1 %v5157_v41  ;;  %v5223_v41 = vld [vmem:[#allocation2 + $0x644] ss:$56 sps:$4 sm:$0xff]  }
  0x83   :  { %1589 = vmatpush2.bf16.msra.mxu0 %v5152_v42  ;;  %v5290_v42 = vld [vmem:[#allocation2 + $0x6b8] ss:$56 sps:$4 sm:$0xff]  }
  0x84   :  { %1630 = vmatpush2.bf16.msra.mxu1 %v5155_v43  ;;  %1590 = vmatprep.subr.bf16.mxu0 %v5160_v44  ;;  %v5298_v43 = vld [vmem:[#allocation2 + $0x64c] ss:$56 sps:$4 sm:$0xff]   ;;  %v5221_v44 = vld [vmem:[#allocation2 + $0x640] ss:$56 sps:$4 sm:$0xff]  }
  0x85   :  { %1631 = vmatprep.subr.bf16.mxu1 %v5163_v45  ;;  %v5226_v45 = vld [vmem:[#allocation2 + $0x5d4] ss:$56 sps:$4 sm:$0xff]  }
  0x87   :  { %1591 = vmatpush2.bf16.msra.mxu0 %v5158_v46  ;;  %v5296_v46 = vld [vmem:[#allocation2 + $0x648] ss:$56 sps:$4 sm:$0xff]  }
  0x88   :  { %1632 = vmatpush2.bf16.msra.mxu1 %v5161_v47  ;;  %1592 = vmatprep.subr.bf16.mxu0 %v5166_v48  ;;  %v5304_v47 = vld [vmem:[#allocation2 + $0x5dc] ss:$56 sps:$4 sm:$0xff]   ;;  %v5224_v48 = vld [vmem:[#allocation2 + $0x5d0] ss:$56 sps:$4 sm:$0xff]  }
  0x89   :  { %1633 = vmatprep.subr.bf16.mxu1 %v5169_v49  ;;  %v5229_v49 = vld [vmem:[#allocation2 + $0x564] ss:$56 sps:$4 sm:$0xff]  }
  0x8b   :  { %1593 = vmatpush2.bf16.msra.mxu0 %v5164_v50  ;;  %v5302_v50 = vld [vmem:[#allocation2 + $0x5d8] ss:$56 sps:$4 sm:$0xff]  }
  0x8c   :  { %1634 = vmatpush2.bf16.msra.mxu1 %v5167_v51  ;;  %1594 = vmatprep.subr.bf16.mxu0 %v5172_v53  ;;  %v5310_v51 = vld [vmem:[#allocation2 + $0x56c] ss:$56 sps:$4 sm:$0xff]   ;;  %v5227_v53 = vld [vmem:[#allocation2 + $0x560] ss:$56 sps:$4 sm:$0xff]  }
  0x8d   :  { %1635 = vmatprep.subr.bf16.mxu1 %v5175_v54  ;;  %v5232_v54 = vld [vmem:[#allocation2 + $0x4f4] ss:$56 sps:$4 sm:$0xff]  }
  0x8f   :  { %1595 = vmatpush2.bf16.msra.mxu0 %v5170_v55  ;;  %v5308_v55 = vld [vmem:[#allocation2 + $0x568] ss:$56 sps:$4 sm:$0xff]  }
  0x90   :  { %1636 = vmatpush2.bf16.msra.mxu1 %v5173_v56  ;;  %1596 = vmatprep.subr.bf16.mxu0 %v5178_v57  ;;  %v5316_v56 = vld [vmem:[#allocation2 + $0x4fc] ss:$56 sps:$4 sm:$0xff]   ;;  %v5230_v57 = vld [vmem:[#allocation2 + $0x4f0] ss:$56 sps:$4 sm:$0xff]  }
  0x91   :  { %1637 = vmatprep.subr.bf16.mxu1 %v5181_v58  ;;  %v5235_v58 = vld [vmem:[#allocation2 + $0x484] ss:$56 sps:$4 sm:$0xff]  }
  0x93   :  { %1597 = vmatpush2.bf16.msra.mxu0 %v5176_v59  ;;  %v5314_v59 = vld [vmem:[#allocation2 + $0x4f8] ss:$56 sps:$4 sm:$0xff]  }
  0x94   :  { %1638 = vmatpush2.bf16.msra.mxu1 %v5179_v60  ;;  %1598 = vmatprep.subr.bf16.mxu0 %v5184_v61  ;;  %v5322_v60 = vld [vmem:[#allocation2 + $0x48c] ss:$56 sps:$4 sm:$0xff]   ;;  %v5233_v61 = vld [vmem:[#allocation2 + $0x480] ss:$56 sps:$4 sm:$0xff]  }
  0x95   :  { %1639 = vmatprep.subr.bf16.mxu1 %v5187_v62  ;;  %v5238_v62 = vld [vmem:[#allocation2 + $0x414] ss:$56 sps:$4 sm:$0xff]  }
  0x97   :  { %1599 = vmatpush2.bf16.msra.mxu0 %v5182_v63  ;;  %v5320_v63 = vld [vmem:[#allocation2 + $0x488] ss:$56 sps:$4 sm:$0xff]  }
  0x98   :  { %1640 = vmatpush2.bf16.msra.mxu1 %v5185_v0  ;;  %1600 = vmatprep.subr.bf16.mxu0 %v5190_v1  ;;  %v5328_v0 = vld [vmem:[#allocation2 + $0x41c] ss:$56 sps:$4 sm:$0xff]   ;;  %v5236_v1 = vld [vmem:[#allocation2 + $0x410] ss:$56 sps:$4 sm:$0xff]  }
  0x99   :  { %1641 = vmatprep.subr.bf16.mxu1 %v5193_v2  ;;  %v5241_v2 = vld [vmem:[#allocation2 + $0x3a4] ss:$56 sps:$4 sm:$0xff]  }
  0x9b   :  { %1601 = vmatpush2.bf16.msra.mxu0 %v5188_v3  ;;  %v5326_v3 = vld [vmem:[#allocation2 + $0x418] ss:$56 sps:$4 sm:$0xff]  }
  0x9c   :  { %1642 = vmatpush2.bf16.msra.mxu1 %v5191_v4  ;;  %1652 = vmatprep.subr.bf16.mxu0 %v5196_v6  ;;  %v5334_v4 = vld [vmem:[#allocation2 + $0x3ac] ss:$56 sps:$4 sm:$0xff]   ;;  %v5239_v6 = vld [vmem:[#allocation2 + $0x3a0] ss:$56 sps:$4 sm:$0xff]  }
  0x9d   :  { %1693 = vmatprep.subr.bf16.mxu1 %v5244_v7  ;;  %v5247_v7 = vld [vmem:[#allocation2 + $0x344] ss:$56 sps:$4 sm:$0xff]  }
  0x9e   :  { %1603 = vmatmul.mubr.bf16.vlgmr.msra.gmra.mxu0 %v5790_v5 }
  0x9f   :  { %1644 = vmatmul.mubr.bf16.vlgmr.msra.gmra.mxu1 %v5790_v5  ;;  %1653 = vmatpush1.bf16.msra.mxu0 %v5194_v8  ;;  %v5332_v8 = vld [vmem:[#allocation2 + $0x3a8] ss:$56 sps:$4 sm:$0xff]  }
  0xa0   :  { %1684 = vmatprep.mubr.bf16.mxu0 %v5786_v52  ;;  %1654 = vmatprep.subr.bf16.mxu0 %v5199_v9  ;;  %v5245_v9 = vld [vmem:[#allocation2 + $0x340] ss:$56 sps:$4 sm:$0xff]  }
  0xa1   :  { %1694 = vmatpush1.bf16.msra.mxu1 %v5242_v10  ;;  %1725 = vmatprep.mubr.bf16.mxu1 %v5786_v52  ;;  %v5253_v10 = vld [vmem:[#allocation2 + $0x2d4] ss:$56 sps:$4 sm:$0xff]  }
  0xa2   :  { %1695 = vmatprep.subr.bf16.mxu1 %v5250_v11  ;;  %v5251_v11 = vld [vmem:[#allocation2 + $0x2d0] ss:$56 sps:$4 sm:$0xff]  }
  0xa3   :  { %1655 = vmatpush1.bf16.msra.mxu0 %v5197_v12  ;;  %v5259_v12 = vld [vmem:[#allocation2 + $0x264] ss:$56 sps:$4 sm:$0xff]  }
  0xa4   :  { %1656 = vmatprep.subr.bf16.mxu0 %v5202_v13  ;;  %v5257_v13 = vld [vmem:[#allocation2 + $0x260] ss:$56 sps:$4 sm:$0xff]  }
  0xa5   :  { %1696 = vmatpush1.bf16.msra.mxu1 %v5248_v14  ;;  %v5265_v14 = vld [vmem:[#allocation2 + $0x1f4] ss:$56 sps:$4 sm:$0xff]  }
  0xa6   :  { %1697 = vmatprep.subr.bf16.mxu1 %v5256_v15  ;;  %v5263_v15 = vld [vmem:[#allocation2 + $0x1f0] ss:$56 sps:$4 sm:$0xff]  }
  0xa7   :  { %1657 = vmatpush1.bf16.msra.mxu0 %v5200_v16  ;;  %v5271_v16 = vld [vmem:[#allocation2 + $0x184] ss:$56 sps:$4 sm:$0xff]  }
  0xa8   :  { %1658 = vmatprep.subr.bf16.mxu0 %v5205_v17  ;;  %v5269_v17 = vld [vmem:[#allocation2 + $0x180] ss:$56 sps:$4 sm:$0xff]  }
  0xa9   :  { %1698 = vmatpush1.bf16.msra.mxu1 %v5254_v18  ;;  %v5277_v18 = vld [vmem:[#allocation2 + $0x114] ss:$56 sps:$4 sm:$0xff]  }
  0xaa   :  { %1699 = vmatprep.subr.bf16.mxu1 %v5262_v19  ;;  %v5275_v19 = vld [vmem:[#allocation2 + $0x110] ss:$56 sps:$4 sm:$0xff]  }
  0xab   :  { %1659 = vmatpush1.bf16.msra.mxu0 %v5203_v20  ;;  %v5283_v20 = vld [vmem:[#allocation2 + $0xa4] ss:$56 sps:$4 sm:$0xff]  }
  0xac   :  { %1660 = vmatprep.subr.bf16.mxu0 %v5208_v21  ;;  %v5281_v21 = vld [vmem:[#allocation2 + $0xa0] ss:$56 sps:$4 sm:$0xff]  }
  0xad   :  { %1700 = vmatpush1.bf16.msra.mxu1 %v5260_v22  ;;  %v5287_v22 = vld [vmem:[#allocation2 + $0x30] ss:$56 sps:$4 sm:$0xff]  }
  0xae   :  { %1701 = vmatprep.subr.bf16.mxu1 %v5268_v23  ;;  %v5295_v23 = vld [vmem:[#allocation2 + $0x6c4] ss:$56 sps:$4 sm:$0xff]  }
  0xaf   :  { %1661 = vmatpush1.bf16.msra.mxu0 %v5206_v24  ;;  %v5293_v24 = vld [vmem:[#allocation2 + $0x6c0] ss:$56 sps:$4 sm:$0xff]  }
  0xb0   :  { %1662 = vmatprep.subr.bf16.mxu0 %v5211_v25  ;;  %v5301_v25 = vld [vmem:[#allocation2 + $0x654] ss:$56 sps:$4 sm:$0xff]  }
  0xb1   :  { %1702 = vmatpush1.bf16.msra.mxu1 %v5266_v26  ;;  %v5299_v26 = vld [vmem:[#allocation2 + $0x650] ss:$56 sps:$4 sm:$0xff]  }
  0xb2   :  { %1703 = vmatprep.subr.bf16.mxu1 %v5274_v27  ;;  %v5307_v27 = vld [vmem:[#allocation2 + $0x5e4] ss:$56 sps:$4 sm:$0xff]  }
  0xb3   :  { %1663 = vmatpush1.bf16.msra.mxu0 %v5209_v28  ;;  %v5305_v28 = vld [vmem:[#allocation2 + $0x5e0] ss:$56 sps:$4 sm:$0xff]  }
  0xb4   :  { %1664 = vmatprep.subr.bf16.mxu0 %v5214_v29  ;;  %v5313_v29 = vld [vmem:[#allocation2 + $0x574] ss:$56 sps:$4 sm:$0xff]  }
  0xb5   :  { %1704 = vmatpush1.bf16.msra.mxu1 %v5272_v30  ;;  %v5311_v30 = vld [vmem:[#allocation2 + $0x570] ss:$56 sps:$4 sm:$0xff]  }
  0xb6   :  { %1705 = vmatprep.subr.bf16.mxu1 %v5280_v31  ;;  %v5319_v31 = vld [vmem:[#allocation2 + $0x504] ss:$56 sps:$4 sm:$0xff]  }
  0xb7   :  { %1665 = vmatpush1.bf16.msra.mxu0 %v5212_v32  ;;  %v5317_v32 = vld [vmem:[#allocation2 + $0x500] ss:$56 sps:$4 sm:$0xff]  }
  0xb8   :  { %1666 = vmatprep.subr.bf16.mxu0 %v5217_v33  ;;  %v5325_v33 = vld [vmem:[#allocation2 + $0x494] ss:$56 sps:$4 sm:$0xff]  }
  0xb9   :  { %1706 = vmatpush1.bf16.msra.mxu1 %v5278_v34  ;;  %v5323_v34 = vld [vmem:[#allocation2 + $0x490] ss:$56 sps:$4 sm:$0xff]  }
  0xba   :  { %1707 = vmatprep.subr.bf16.mxu1 %v5286_v35  ;;  %v5331_v35 = vld [vmem:[#allocation2 + $0x424] ss:$56 sps:$4 sm:$0xff]  }
  0xbb   :  { %1667 = vmatpush1.bf16.msra.mxu0 %v5215_v36  ;;  %v5329_v36 = vld [vmem:[#allocation2 + $0x420] ss:$56 sps:$4 sm:$0xff]  }
  0xbc   :  { %1668 = vmatprep.subr.bf16.mxu0 %v5220_v37  ;;  %v5337_v37 = vld [vmem:[#allocation2 + $0x3b4] ss:$56 sps:$4 sm:$0xff]  }
  0xbd   :  { %1708 = vmatpush1.bf16.msra.mxu1 %v5284_v38  ;;  %v5335_v38 = vld [vmem:[#allocation2 + $0x3b0] ss:$56 sps:$4 sm:$0xff]  }
  0xbe   :  { %1709 = vmatprep.subr.bf16.mxu1 %v5292_v39 }
  0xbf   :  { %1669 = vmatpush2.bf16.msra.mxu0 %v5218_v40 }
  0xc0   :  { %1670 = vmatprep.subr.bf16.mxu0 %v5223_v41 }
  0xc1   :  { %1710 = vmatpush2.bf16.msra.mxu1 %v5290_v42 }
  0xc2   :  { %1711 = vmatprep.subr.bf16.mxu1 %v5298_v43 }
  0xc3   :  { %1671 = vmatpush2.bf16.msra.mxu0 %v5221_v44 }
  0xc4   :  { %1672 = vmatprep.subr.bf16.mxu0 %v5226_v45 }
  0xc5   :  { %1712 = vmatpush2.bf16.msra.mxu1 %v5296_v46 }
  0xc6   :  { %1713 = vmatprep.subr.bf16.mxu1 %v5304_v47  ;;  %v5338_v47 = vld [vmem:[#allocation5 + $0xe0] ss:$16 sps:$4 sm:$0xff]  }
  0xc7   :  { %1673 = vmatpush2.bf16.msra.mxu0 %v5224_v48  ;;  %v5340_v48 = vld [vmem:[#allocation5 + $0xe4] ss:$16 sps:$4 sm:$0xff]  }
  0xc8   :  { %1674 = vmatprep.subr.bf16.mxu0 %v5229_v49  ;;  %v5341_v49 = vld [vmem:[#allocation5 + $0x2e0] ss:$16 sps:$4 sm:$0xff]  }
  0xc9   :  { %1714 = vmatpush2.bf16.msra.mxu1 %v5302_v50  ;;  %v5343_v50 = vld [vmem:[#allocation5 + $0x2e4] ss:$16 sps:$4 sm:$0xff]  }
  0xca   :  { %1715 = vmatprep.subr.bf16.mxu1 %v5310_v51  ;;  %v5346_v51 = vld [vmem:[#allocation5 + $0xc4] ss:$16 sps:$4 sm:$0xff]  }
  0xcb   :  { %1675 = vmatpush2.bf16.msra.mxu0 %v5227_v53  ;;  %v5349_v53 = vld [vmem:[#allocation5 + $0x2c4] ss:$16 sps:$4 sm:$0xff]  }
  0xcc   :  { %1676 = vmatprep.subr.bf16.mxu0 %v5232_v54  ;;  %v5347_v54 = vld [vmem:[#allocation5 + $0x2c0] ss:$16 sps:$4 sm:$0xff]  }
  0xcd   :  { %1716 = vmatpush2.bf16.msra.mxu1 %v5308_v55  ;;  %v5352_v55 = vld [vmem:[#allocation5 + $0xa4] ss:$16 sps:$4 sm:$0xff]  }
  0xce   :  { %1717 = vmatprep.subr.bf16.mxu1 %v5316_v56  ;;  %v5355_v56 = vld [vmem:[#allocation5 + $0x2a4] ss:$16 sps:$4 sm:$0xff]  }
  0xcf   :  { %1677 = vmatpush2.bf16.msra.mxu0 %v5230_v57  ;;  %v5350_v57 = vld [vmem:[#allocation5 + $0xa0] ss:$16 sps:$4 sm:$0xff]  }
  0xd0   :  { %1678 = vmatprep.subr.bf16.mxu0 %v5235_v58  ;;  %v5353_v58 = vld [vmem:[#allocation5 + $0x2a0] ss:$16 sps:$4 sm:$0xff]  }
  0xd1   :  { %1718 = vmatpush2.bf16.msra.mxu1 %v5314_v59  ;;  %v5358_v59 = vld [vmem:[#allocation5 + $0x84] ss:$16 sps:$4 sm:$0xff]  }
  0xd2   :  { %1719 = vmatprep.subr.bf16.mxu1 %v5322_v60  ;;  %v5361_v60 = vld [vmem:[#allocation5 + $0x284] ss:$16 sps:$4 sm:$0xff]  }
  0xd3   :  { %1679 = vmatpush2.bf16.msra.mxu0 %v5233_v61  ;;  %v5356_v61 = vld [vmem:[#allocation5 + $0x80] ss:$16 sps:$4 sm:$0xff]  }
  0xd4   :  { %1680 = vmatprep.subr.bf16.mxu0 %v5238_v62  ;;  %v5359_v62 = vld [vmem:[#allocation5 + $0x280] ss:$16 sps:$4 sm:$0xff]  }
  0xd5   :  { %1720 = vmatpush2.bf16.msra.mxu1 %v5320_v63  ;;  %v5364_v63 = vld [vmem:[#allocation5 + $0x64] ss:$16 sps:$4 sm:$0xff]  }
  0xd6   :  { %1721 = vmatprep.subr.bf16.mxu1 %v5328_v0  ;;  %v5367_v0 = vld [vmem:[#allocation5 + $0x264] ss:$16 sps:$4 sm:$0xff]  }
  0xd7   :  { %1681 = vmatpush2.bf16.msra.mxu0 %v5236_v1  ;;  %v5362_v1 = vld [vmem:[#allocation5 + $0x60] ss:$16 sps:$4 sm:$0xff]  }
  0xd8   :  { %1682 = vmatprep.subr.bf16.mxu0 %v5241_v2  ;;  %v5365_v2 = vld [vmem:[#allocation5 + $0x260] ss:$16 sps:$4 sm:$0xff]  }
  0xd9   :  { %1722 = vmatpush2.bf16.msra.mxu1 %v5326_v3  ;;  %v5370_v3 = vld [vmem:[#allocation5 + $0x44] ss:$16 sps:$4 sm:$0xff]  }
  0xda   :  { %1723 = vmatprep.subr.bf16.mxu1 %v5334_v4  ;;  %v5373_v4 = vld [vmem:[#allocation5 + $0x244] ss:$16 sps:$4 sm:$0xff]  }
  0xdb   :  { %1683 = vmatpush2.bf16.msra.mxu0 %v5239_v6  ;;  %v5368_v6 = vld [vmem:[#allocation5 + $0x40] ss:$16 sps:$4 sm:$0xff]  }
  0xdc   :  { %1734 = vmatprep.subr.bf16.mxu0 %v5247_v7  ;;  %v5371_v7 = vld [vmem:[#allocation5 + $0x240] ss:$16 sps:$4 sm:$0xff]  }
  0xdd   :  { %1724 = vmatpush2.bf16.msra.mxu1 %v5332_v8  ;;  %v298_v8 = vlaneseq }
  0xde   :  { %1685 = vmatmul.mubr.bf16.vlgmr.msra.gmra.mxu0 %v5790_v5  ;;  %2856 = vmatprep.subr.bf16.mxu1 %v5340_v48 }
  0xdf   :  { %1735 = vmatpush1.bf16.msra.mxu0 %v5245_v9  ;;  %1766 = vmatprep.mubr.bf16.mxu0 %v5786_v52  ;;  %v5289_v52 = vld [vmem:[#allocation2 + $0x34] ss:$56 sps:$4 sm:$0xff]   ;;  %v5812_v9 = vshrl.u32 %v298_v8, 7 }
  0xe0   :  { %1726 = vmatmul.mubr.bf16.vlgmr.msra.gmra.mxu1 %v5790_v5  ;;  %1736 = vmatprep.subr.bf16.mxu0 %v5253_v10  ;;  %v5388_v8 = vld [vmem:[#allocation5 + $0x1e4] ss:$16 sps:$4 sm:$0xff]  }
  0xe1   :  { %2857 = vmatpush1.bf16.msra.mxu1 %v5338_v47  ;;  %v5815_v10 = vsub.s32 2, %v5812_v9  ;;  %v5377_v47 = vld [vmem:[#allocation5 + $0x220] ss:$16 sps:$4 sm:$0xff]  }
  0xe2   :  { %2858 = vmatprep.subr.bf16.mxu1 %v5346_v51 }
  0xe3   :  { %1737 = vmatpush1.bf16.msra.mxu0 %v5251_v11  ;;  %v5818_v11 = vsub.s32 0, %v5812_v9 }
  0xe4   :  { %1738 = vmatprep.subr.bf16.mxu0 %v5259_v12  ;;  %v5821_v12 = vsub.s32 3, %v5812_v9 }
  0xe7   :  { %1739 = vmatpush1.bf16.msra.mxu0 %v5257_v13  ;;  %v294_v13 = vld [vmem:[%s6126_s2] sm:$0xff] }
  0xe8   :  { %1740 = vmatprep.subr.bf16.mxu0 %v5265_v14  ;;  %v5827_v14 = vsub.s32 1, %v5812_v9 }
  0xeb   :  { %1741 = vmatpush1.bf16.msra.mxu0 %v5263_v15  ;;  %v309_v15 = vrot.slane %v294_v13, %v5815_v10 }
  0xec   :  { %1742 = vmatprep.subr.bf16.mxu0 %v5271_v16  ;;  %v316_v16 = vsub.s32 4, %v5812_v9 }
  0xef   :  { %1743 = vmatpush1.bf16.msra.mxu0 %v5269_v17  ;;  %v324_v17 = vsub.s32 6, %v5812_v9 }
  0xf0   :  { %1744 = vmatprep.subr.bf16.mxu0 %v5277_v18  ;;  %v301_v18 = vrot.slane %v294_v13, %v5818_v11 }
  0xf3   :  { %1745 = vmatpush1.bf16.msra.mxu0 %v5275_v19  ;;  %v313_v19 = vrot.slane %v294_v13, %v5821_v12 }
  0xf4   :  { %1746 = vmatprep.subr.bf16.mxu0 %v5283_v20  ;;  %v5718_v20 = vmov 1983009808  }
  0xf7   :  { %1747 = vmatpush1.bf16.msra.mxu0 %v5281_v21  ;;  %v1789_v21 = vunpack.c.l.s4 %v5718_v20  ;;  %v5397_v20 = vld [vmem:[#allocation5 + $0x3c4] ss:$16 sps:$4 sm:$0xff]  }
  0xf8   :  { %1748 = vmatprep.subr.bf16.mxu0 %v5289_v52  ;;  %v320_v52 = vsub.s32 5, %v5812_v9 }
  0xfb   :  { %1749 = vmatpush1.bf16.msra.mxu0 %v5287_v22  ;;  %v328_v22 = vsub.s32 7, %v5812_v9 }
  0xfc   :  { %1750 = vmatprep.subr.bf16.mxu0 %v5295_v23  ;;  %v305_v23 = vrot.slane %v294_v13, %v5827_v14 }
  0xff   :  { %1751 = vmatpush2.bf16.msra.mxu0 %v5293_v24 }
 0x100   :  { %1752 = vmatprep.subr.bf16.mxu0 %v5301_v25  ;;  %v317_v25 = vrot.slane %v294_v13, %v316_v16 }
 0x103   :  { %1753 = vmatpush2.bf16.msra.mxu0 %v5299_v26  ;;  %v325_v26 = vrot.slane %v294_v13, %v324_v17  ;;  %v5389_v17 = vld [vmem:[#allocation5 + $0x3e0] ss:$16 sps:$4 sm:$0xff]  }
 0x104   :  { %1754 = vmatprep.subr.bf16.mxu0 %v5307_v27 }
 0x107   :  { %1755 = vmatpush2.bf16.msra.mxu0 %v5305_v28 }
 0x108   :  { %1756 = vmatprep.subr.bf16.mxu0 %v5313_v29  ;;  %v1790_v29 = vunpack.c.0.s8 %v1789_v21  ;;  %v5392_v21 = vld [vmem:[#allocation5 + $0x1c0] ss:$16 sps:$4 sm:$0xff]  }
 0x10b   :  { %1757 = vmatpush2.bf16.msra.mxu0 %v5311_v30  ;;  %v321_v30 = vrot.slane %v294_v13, %v320_v52 }
 0x10c   :  { %1758 = vmatprep.subr.bf16.mxu0 %v5319_v31  ;;  %v329_v31 = vrot.slane %v294_v13, %v328_v22  ;;  %v5391_v13 = vld [vmem:[#allocation5 + $0x3e4] ss:$16 sps:$4 sm:$0xff]   ;;  %v5395_v22 = vld [vmem:[#allocation5 + $0x3c0] ss:$16 sps:$4 sm:$0xff]  }
 0x10f   :  { %1759 = vmatpush2.bf16.msra.mxu0 %v5317_v32 }
 0x110   :  { %1760 = vmatprep.subr.bf16.mxu0 %v5325_v33 }
 0x113   :  { %1761 = vmatpush2.bf16.msra.mxu0 %v5323_v34 }
 0x114   :  { %1762 = vmatprep.subr.bf16.mxu0 %v5331_v35 }
 0x117   :  { %1763 = vmatpush2.bf16.msra.mxu0 %v5329_v36 }
 0x118   :  { %1764 = vmatprep.subr.bf16.mxu0 %v5337_v37 }
 0x11b   :  { %1765 = vmatpush2.bf16.msra.mxu0 %v5335_v38  ;;  %v5376_v38 = vld [vmem:[#allocation5 + $0x24] ss:$16 sps:$4 sm:$0xff]  }
 0x11c   :  { %2899 = vmatprep.subr.bf16.mxu0 %v5343_v50 }
 0x11e   :  { %v5803_v39 = vpop.f32.mrf.mxu0  ;;  %1767 = vmatmul.mubr.bf16.vlgmr.msra.gmra.mxu0 %v5790_v5  ;;  %v5344_v5 = vld [vmem:[#allocation5 + $0xc0] ss:$16 sps:$4 sm:$0xff]  }
 0x11f   :  { %v5806_v40 = vpop.f32.mrf.mxu1  ;;  %2900 = vmatpush1.bf16.msra.mxu0 %v5341_v49  ;;  %2859 = vmatpush1.bf16.msra.mxu1 %v5344_v5  ;;  %v1523_v27 = vadd.f32 %v5803_v39, %v301_v18  ;;  %v5846_v39 = vsub.s32 %v1790_v29, %v5812_v9  ;;  %v5404_v29 = vld [vmem:[#allocation5 + $0x180] ss:$16 sps:$4 sm:$0xff]  }
 0x120   :  { %v5808_v41 = vpop.f32.mrf.mxu0  ;;  %2901 = vmatprep.subr.bf16.mxu0 %v5349_v53  ;;  %2860 = vmatprep.subr.bf16.mxu1 %v5352_v55  ;;  %v1564_v24 = vadd.f32 %v5806_v40, %v309_v15  ;;  %v5379_v40 = vld [vmem:[#allocation5 + $0x224] ss:$16 sps:$4 sm:$0xff]   ;;  %v5386_v15 = vld [vmem:[#allocation5 + $0x1e0] ss:$16 sps:$4 sm:$0xff]  }
 0x121   :  { %v5810_v42 = vpop.f32.mrf.mxu1  ;;  %v1525_v32 = vadd.f32 %v5808_v41, %v305_v23  ;;  %v5400_v23 = vld [vmem:[#allocation5 + $0x1a4] ss:$16 sps:$4 sm:$0xff]  }
 0x122   :  { %v1526_v43 = vpop.f32.mrf.mxu0  ;;  %v1566_v28 = vadd.f32 %v5810_v42, %v313_v19  ;;  %v1777_v35 = vmax.f32 %v1564_v24, 0.0  ;;  %v5394_v19 = vld [vmem:[#allocation5 + $0x1c4] ss:$16 sps:$4 sm:$0xff]  }
 0x123   :  { %v1567_v44 = vpop.f32.mrf.mxu1  ;;  %2902 = vmatpush1.bf16.msra.mxu0 %v5347_v54  ;;  %2861 = vmatpush1.bf16.msra.mxu1 %v5350_v57  ;;  %v1775_v43 = vmax.f32 %v1523_v27, 0.0  ;;  %v1776_v51 = vmax.f32 %v1525_v32, 0.0  ;;  %v5403_v24 = vld [vmem:[#allocation5 + $0x3a4] ss:$16 sps:$4 sm:$0xff]  }
 0x124   :  { %v1527_v45 = vpop.f32.mrf.mxu0  ;;  %2903 = vmatprep.subr.bf16.mxu0 %v5355_v56  ;;  %2862 = vmatprep.subr.bf16.mxu1 %v5358_v59  ;;  %v1778_v44 = vmax.f32 %v1566_v28, 0.0  ;;  %v5385_v59 = vld [vmem:[#allocation5 + $0x204] ss:$16 sps:$4 sm:$0xff]  }
 0x125   :  { %v1568_v46 = vpop.f32.mrf.mxu1  ;;  %v5406_v27 = vld [vmem:[#allocation5 + $0x184] ss:$16 sps:$4 sm:$0xff]  }
 0x126   :  { %v5374_v46 = vld [vmem:[#allocation5 + $0x20] ss:$16 sps:$4 sm:$0xff]   ;;  %v5409_v28 = vld [vmem:[#allocation5 + $0x384] ss:$16 sps:$4 sm:$0xff]  }
 0x127   :  { %2904 = vmatpush1.bf16.msra.mxu0 %v5353_v58  ;;  %2863 = vmatpush1.bf16.msra.mxu1 %v5356_v61  ;;  %v5382_v58 = vld [vmem:[#allocation5 + $0x4] ss:$16 sps:$4 sm:$0xff]  }
 0x128   :  { %2905 = vmatprep.subr.bf16.mxu0 %v5361_v60  ;;  %2864 = vmatprep.subr.bf16.mxu1 %v5364_v63  ;;  %v5383_v63 = vld [vmem:[#allocation5 + $0x200] ss:$16 sps:$4 sm:$0xff]   ;;  %v5412_v32 = vld [vmem:[#allocation5 + $0x164] ss:$16 sps:$4 sm:$0xff]  }
 0x12b   :  { %2906 = vmatpush1.bf16.msra.mxu0 %v5359_v62  ;;  %2865 = vmatpush1.bf16.msra.mxu1 %v5362_v1  ;;  %v5380_v62 = vld [vmem:[#allocation5] ss:$16 sps:$4 sm:$0xff]  }
 0x12c   :  { %2907 = vmatprep.subr.bf16.mxu0 %v5367_v0  ;;  %2866 = vmatprep.subr.bf16.mxu1 %v5370_v3 }
 0x12f   :  { %2908 = vmatpush1.bf16.msra.mxu0 %v5365_v2  ;;  %2867 = vmatpush1.bf16.msra.mxu1 %v5368_v6 }
 0x130   :  { %2909 = vmatprep.subr.bf16.mxu0 %v5373_v4  ;;  %2868 = vmatprep.subr.bf16.mxu1 %v5376_v38  ;;  %v5419_v38 = vld [vmem:[#allocation5 + $0x340] ss:$16 sps:$4 sm:$0xff]  }
 0x133   :  { %2910 = vmatpush1.bf16.msra.mxu0 %v5371_v7  ;;  %2869 = vmatpush1.bf16.msra.mxu1 %v5374_v46  ;;  %v5433_v46 = vld [vmem:[#allocation5 + $0x304] ss:$16 sps:$4 sm:$0xff]  }
 0x134   :  { %2911 = vmatprep.subr.bf16.mxu0 %v5379_v40  ;;  %2870 = vmatprep.subr.bf16.mxu1 %v5382_v58  ;;  %v5424_v40 = vld [vmem:[#allocation5 + $0x124] ss:$16 sps:$4 sm:$0xff]   ;;  %v295_v58 = vld [vmem:[%s6126_s2 + $0x8] sm:$0x3f] }
 0x137   :  { %2912 = vmatpush1.bf16.msra.mxu0 %v5377_v47  ;;  %2871 = vmatpush1.bf16.msra.mxu1 %v5380_v62  ;;  %v5428_v47 = vld [vmem:[#allocation5 + $0x100] ss:$16 sps:$4 sm:$0xff]   ;;  %v349_v62 = vrot.slane %v295_v58, %v316_v16 }
 0x138   :  { %2913 = vmatprep.subr.bf16.mxu0 %v5385_v59  ;;  %2872 = vmatprep.subr.bf16.mxu1 %v5388_v8  ;;  %v333_v59 = vrot.slane %v295_v58, %v5818_v11  ;;  %v345_v8 = vrot.slane %v295_v58, %v5821_v12 }
 0x13b   :  { %2914 = vmatpush1.bf16.msra.mxu0 %v5383_v63  ;;  %2873 = vmatpush2.bf16.msra.mxu1 %v5386_v15  ;;  %v5719_v63 = vmov 1934713408  }
 0x13c   :  { %2915 = vmatprep.subr.bf16.mxu0 %v5391_v13  ;;  %2874 = vmatprep.subr.bf16.mxu1 %v5394_v19 }
 0x13f   :  { %2916 = vmatpush2.bf16.msra.mxu0 %v5389_v17  ;;  %2875 = vmatpush2.bf16.msra.mxu1 %v5392_v21 }
 0x140   :  { %2917 = vmatprep.subr.bf16.mxu0 %v5397_v20  ;;  %2876 = vmatprep.subr.bf16.mxu1 %v5400_v23 }
 0x143   :  { %2918 = vmatpush2.bf16.msra.mxu0 %v5395_v22 }
 0x144   :  { %2919 = vmatprep.subr.bf16.mxu0 %v5403_v24 }
 0x15e   :  { %v1604_v33 = vpop.f32.mrf.mxu0 }
 0x15f   :  { %v1645_v34 = vpop.f32.mrf.mxu1  ;;  %v1605_v36 = vadd.f32 %v1604_v33, %v317_v25  ;;  %v5398_v25 = vld [vmem:[#allocation5 + $0x1a0] ss:$16 sps:$4 sm:$0xff]  }
 0x160   :  { %v1646_v37 = vadd.f32 %v1645_v34, %v325_v26  ;;  %v1606_v42 = vpop.f32.mrf.mxu0  ;;  %v5401_v26 = vld [vmem:[#allocation5 + $0x3a0] ss:$16 sps:$4 sm:$0xff]   ;;  %2877 = vmatpush2.bf16.msra.mxu1 %v5398_v25  ;;  %v5415_v34 = vld [vmem:[#allocation5 + $0x364] ss:$16 sps:$4 sm:$0xff]  }
 0x161   :  { %v1647_v45 = vpop.f32.mrf.mxu1  ;;  %v1779_v48 = vmax.f32 %v1605_v36, 0.0  ;;  %v1607_v50 = vadd.f32 %v1606_v42, %v321_v30  ;;  %2920 = vmatpush2.bf16.msra.mxu0 %v5401_v26  ;;  %v5407_v30 = vld [vmem:[#allocation5 + $0x380] ss:$16 sps:$4 sm:$0xff]   ;;  %2878 = vmatprep.subr.bf16.mxu1 %v5406_v27  ;;  %v5421_v36 = vld [vmem:[#allocation5 + $0x344] ss:$16 sps:$4 sm:$0xff]  }
 0x162   :  { %v1781_v49 = vmax.f32 %v1646_v37, 0.0  ;;  %v1648_v41 = vadd.f32 %v1647_v45, %v329_v31  ;;  %v1608_v53 = vpop.f32.mrf.mxu0  ;;  %2921 = vmatprep.subr.bf16.mxu0 %v5409_v28  ;;  %v5410_v31 = vld [vmem:[#allocation5 + $0x160] ss:$16 sps:$4 sm:$0xff]   ;;  %v5430_v45 = vld [vmem:[#allocation5 + $0x104] ss:$16 sps:$4 sm:$0xff]  }
 0x163   :  { %v1649_v5 = vpop.f32.mrf.mxu1  ;;  %v1787_v54 = vcombine.low %v1775_v43, %v1779_v48  ;;  %v1780_v56 = vmax.f32 %v1607_v50, 0.0  ;;  %v5413_v33 = vld [vmem:[#allocation5 + $0x360] ss:$16 sps:$4 sm:$0xff]   ;;  %v5427_v43 = vld [vmem:[#allocation5 + $0x324] ss:$16 sps:$4 sm:$0xff]  }
 0x164   :  { %v1795_v55 = vcombine.low %v1777_v35, %v1781_v49  ;;  %v1782_v57 = vmax.f32 %v1648_v41, 0.0  ;;  %v1609_v60 = vpop.f32.mrf.mxu0  ;;  %2879 = vmatpush2.bf16.msra.mxu1 %v5404_v29  ;;  %v5418_v35 = vld [vmem:[#allocation5 + $0x144] ss:$16 sps:$4 sm:$0xff]   ;;  %v5416_v37 = vld [vmem:[#allocation5 + $0x140] ss:$16 sps:$4 sm:$0xff]  }
 0x165   :  { %v1650_v61 = vpop.f32.mrf.mxu1  ;;  %v1794_v0 = vrot.slane %v1787_v54, %v5846_v39  ;;  %v1830_v2 = vcombine.low %v1776_v51, %v1780_v56  ;;  %2922 = vmatpush2.bf16.msra.mxu0 %v5407_v30  ;;  %2880 = vmatprep.subr.bf16.mxu1 %v5412_v32  ;;  %v5425_v42 = vld [vmem:[#allocation5 + $0x320] ss:$16 sps:$4 sm:$0xff]   ;;  %v5436_v49 = vld [vmem:[#allocation5 + $0xec] ss:$16 sps:$4 sm:$0xff]   ;;  %v341_v60 = vrot.slane %v295_v58, %v5815_v10 }
 0x166   :  { %v1802_v1 = vrot.slane %v1795_v55, %v5846_v39  ;;  %v1838_v3 = vcombine.low %v1778_v44, %v1782_v57  ;;  %2923 = vmatprep.subr.bf16.mxu0 %v5415_v34  ;;  %v5422_v44 = vld [vmem:[#allocation5 + $0x120] ss:$16 sps:$4 sm:$0xff]   ;;  %v5439_v50 = vld [vmem:[#allocation5 + $0x2ec] ss:$16 sps:$4 sm:$0xff]   ;;  %v337_v61 = vrot.slane %v295_v58, %v5827_v14 }
 0x167   :  { %v1837_v6 = vrot.slane %v1830_v2, %v5846_v39  ;;  %v5431_v48 = vld [vmem:[#allocation5 + $0x300] ss:$16 sps:$4 sm:$0xff]   ;;  %v353_v2 = vrot.slane %v295_v58, %v320_v52 }
 0x168   :  { %v5850_v4 = vcombine.low %v1794_v0, %v1802_v1  ;;  %v1845_v7 = vrot.slane %v1838_v3, %v5846_v39  ;;  %2881 = vmatpush2.bf16.msra.mxu1 %v5410_v31  ;;  %v1814_v0 = vunpack.c.l.s4 %v5719_v63 }
 0x169   :  { %2924 = vmatpush2.bf16.msra.mxu0 %v5413_v33  ;;  %2882 = vmatprep.subr.bf16.mxu1 %v5418_v35  ;;  %v5720_v33 = vmov 1966171168  }
 0x16a   :  { %v5854_v18 = vcombine.low %v1837_v6, %v1845_v7  ;;  %2925 = vmatprep.subr.bf16.mxu0 %v5421_v36  ;;  %v1815_v17 = vunpack.c.0.s8 %v1814_v0  ;;  %v1909_v34 = vunpack.c.l.s4 %v5720_v33 }
 0x16c   :  { %2883 = vmatpush2.bf16.msra.mxu1 %v5416_v37  ;;  %v5868_v52 = vsub.s32 %v1815_v17, %v5812_v9 }
 0x16d   :  { %2926 = vmatpush2.bf16.msra.mxu0 %v5419_v38  ;;  %2884 = vmatprep.subr.bf16.mxu1 %v5424_v40 }
 0x16e   :  { %2927 = vmatprep.subr.bf16.mxu0 %v5427_v43  ;;  %v1819_v35 = vrot.slane %v5850_v4, %v5868_v52  ;;  %v1862_v38 = vrot.slane %v5854_v18, %v5868_v52 }
 0x170   :  { %2885 = vmatpush2.bf16.msra.mxu1 %v5422_v44 }
 0x171   :  { %2928 = vmatpush2.bf16.msra.mxu0 %v5425_v42  ;;  %2886 = vmatprep.subr.bf16.mxu1 %v5430_v45  ;;  %v1910_v42 = vunpack.c.0.s8 %v1909_v34 }
 0x172   :  { %2929 = vmatprep.subr.bf16.mxu0 %v5433_v46 }
 0x173   :  { %v5879_v4 = vsub.s32 %v1910_v42, %v5812_v9  ;;  %v5437_v42 = vld [vmem:[#allocation5 + $0x2e8] ss:$16 sps:$4 sm:$0xff]  }
 0x174   :  { %2887 = vmatpush2.bf16.msra.mxu1 %v5428_v47 }
 0x175   :  { %2930 = vmatpush2.bf16.msra.mxu0 %v5431_v48  ;;  %2942 = vmatprep.subr.bf16.mxu1 %v5436_v49 }
 0x176   :  { %2985 = vmatprep.subr.bf16.mxu0 %v5439_v50 }
 0x19e   :  { %v1686_v41 = vpop.f32.mrf.mxu0 }
 0x19f   :  { %v1687_v1 = vadd.f32 %v1686_v41, %v333_v59 }
 0x1a0   :  { %v1727_v51 = vpop.f32.mrf.mxu1  ;;  %v1688_v53 = vpop.f32.mrf.mxu0 }
 0x1a1   :  { %v1728_v3 = vadd.f32 %v1727_v51, %v341_v60  ;;  %v1689_v7 = vadd.f32 %v1688_v53, %v337_v61  ;;  %v1783_v19 = vmax.f32 %v1687_v1, 0.0 }
 0x1a2   :  { %v1729_v5 = vpop.f32.mrf.mxu1  ;;  %v1690_v54 = vpop.f32.mrf.mxu0 }
 0x1a3   :  { %v1811_v22 = vmax.f32 %v1728_v3, 0.0  ;;  %v1784_v16 = vmax.f32 %v1689_v7, 0.0  ;;  %v1730_v24 = vadd.f32 %v1729_v5, %v345_v8 }
 0x1a4   :  { %v1731_v55 = vpop.f32.mrf.mxu1  ;;  %v1691_v56 = vpop.f32.mrf.mxu0 }
 0x1a5   :  { %v1854_v30 = vmax.f32 %v1730_v24, 0.0 }
 0x1a6   :  { %v1732_v57 = vpop.f32.mrf.mxu1 }
 0x1de   :  { %v1768_v6 = vpop.f32.mrf.mxu0 }
 0x1df   :  { %v1769_v13 = vadd.f32 %v1768_v6, %v349_v62 }
 0x1e0   :  { %v1770_v15 = vpop.f32.mrf.mxu0 }
 0x1e1   :  { %v1785_v20 = vmax.f32 %v1769_v13, 0.0  ;;  %v1771_v21 = vadd.f32 %v1770_v15, %v353_v2 }
 0x1e2   :  { %v1772_v23 = vpop.f32.mrf.mxu0 }
 0x1e3   :  { %v1803_v25 = vcombine.low %v1783_v19, %v1785_v20  ;;  %v1786_v26 = vmax.f32 %v1771_v21, 0.0 }
 0x1e4   :  { %v1773_v27 = vpop.f32.mrf.mxu0 }
 0x1e5   :  { %v1810_v28 = vrot.slane %v1803_v25, %v5846_v39  ;;  %v1846_v29 = vcombine.low %v1784_v16, %v1786_v26 }
 0x1e7   :  { %v1820_v31 = vcombine.low %v1810_v28, %v1811_v22  ;;  %v1853_v32 = vrot.slane %v1846_v29, %v5846_v39 }
 0x1e9   :  { %v1827_v36 = vrot.slane %v1820_v31, %v5868_v52  ;;  %v1863_v37 = vcombine.low %v1853_v32, %v1854_v30 }
 0x1eb   :  { %v1828_v40 = vcombine.low %v1819_v35, %v1827_v36  ;;  %v1829_v43 = vcombine.high %v1819_v35, %v1827_v36  ;;  %v1870_v44 = vrot.slane %v1863_v37, %v5868_v52 }
 0x1ed   :  { %v1877_v45 = vrot.slane %v1828_v40, 1  ;;  %v1879_v46 = vrot.slane %v1829_v43, 1  ;;  %v1871_v47 = vcombine.low %v1862_v38, %v1870_v44  ;;  %v1872_v48 = vcombine.high %v1862_v38, %v1870_v44  ;;  %v5434_v44 = vld [vmem:[#allocation5 + $0xe8] ss:$16 sps:$4 sm:$0xff]  }
 0x1ef   :  { %v1878_v49 = vrot.slane %v1871_v47, 1  ;;  %v1880_v50 = vrot.slane %v1872_v48, 1  ;;  %v4730_v41 = vpack.c.bf16 %v1871_v47, %v1828_v40  ;;  %v4732_v51 = vpack.c.bf16 %v1872_v48, %v1829_v43  ;;  %v5442_v47 = vld [vmem:[#allocation5 + $0xcc] ss:$16 sps:$4 sm:$0xff]  }
 0x1f0   :  { %v1886_v53 = vsel %vm1885_vm0, %v1877_v45, 0.0  ;;  %v1888_v5 = vsel %vm1885_vm0, %v1879_v46, 0.0  ;;  %v5445_v48 = vld [vmem:[#allocation5 + $0x2cc] ss:$16 sps:$4 sm:$0xff]  }
 0x1f1   :  { %v1887_v18 = vsel %vm1885_vm0, %v1878_v49, 0.0  ;;  %v1889_v54 = vsel %vm1885_vm0, %v1880_v50, 0.0  ;;  %v1914_v57 = vrot.slane %v4730_v41, %v5879_v4  ;;  %v1948_v58 = vrot.slane %v4732_v51, %v5879_v4  ;;  %v5440_v49 = vld [vmem:[#allocation5 + $0xc8] ss:$16 sps:$4 sm:$0xff]   ;;  %v5448_v41 = vld [vmem:[#allocation5 + $0xac] ss:$16 sps:$4 sm:$0xff]  }
 0x1f2   :  { %v4731_v55 = vpack.c.bf16 %v1887_v18, %v1886_v53  ;;  %v4733_v56 = vpack.c.bf16 %v1889_v54, %v1888_v5  ;;  %v5443_v50 = vld [vmem:[#allocation5 + $0x2c8] ss:$16 sps:$4 sm:$0xff]   ;;  %v5451_v51 = vld [vmem:[#allocation5 + $0x2ac] ss:$16 sps:$4 sm:$0xff]   ;;  %vm4483_vm0 = vcmask 1041408  }
 0x1f3   :  { %v5446_v53 = vld [vmem:[#allocation5 + $0xa8] ss:$16 sps:$4 sm:$0xff]   ;;  %v5454_v18 = vld [vmem:[#allocation5 + $0x8c] ss:$16 sps:$4 sm:$0xff]  }
 0x1f4   :  { %v1955_v59 = vrot.slane %v4733_v56, %v5879_v4  ;;  %v1921_v60 = vrot.slane %v4731_v55, %v5879_v4  ;;  %v5449_v5 = vld [vmem:[#allocation5 + $0x2a8] ss:$16 sps:$4 sm:$0xff]   ;;  %v5457_v54 = vld [vmem:[#allocation5 + $0x28c] ss:$16 sps:$4 sm:$0xff]  }
 0x1f5   :  { %v5452_v55 = vld [vmem:[#allocation5 + $0x88] ss:$16 sps:$4 sm:$0xff]  }
 0x1f6   :  { %v1956_v61 = vcombine.low %v1948_v58, %v1955_v59  ;;  %v1957_v62 = vcombine.high %v1948_v58, %v1955_v59  ;;  %v1922_v63 = vcombine.low %v1914_v57, %v1921_v60  ;;  %v1923_v0 = vcombine.high %v1914_v57, %v1921_v60  ;;  %v5455_v56 = vld [vmem:[#allocation5 + $0x288] ss:$16 sps:$4 sm:$0xff]   ;;  %v5460_v57 = vld [vmem:[#allocation5 + $0x6c] ss:$16 sps:$4 sm:$0xff]  }
 0x1f7   :  { %v5463_v58 = vld [vmem:[#allocation5 + $0x26c] ss:$16 sps:$4 sm:$0xff]   ;;  %v5458_v59 = vld [vmem:[#allocation5 + $0x68] ss:$16 sps:$4 sm:$0xff]  }
 0x1f8   :  { %v1930_v1 = vrot.slane %v1922_v63, %v5879_v4  ;;  %v1937_v2 = vrot.slane %v1923_v0, %v5879_v4  ;;  %v1964_v3 = vrot.slane %v1956_v61, %v5879_v4  ;;  %v1971_v6 = vrot.slane %v1957_v62, %v5879_v4  ;;  %v5461_v60 = vld [vmem:[#allocation5 + $0x268] ss:$16 sps:$4 sm:$0xff]   ;;  %v5466_v61 = vld [vmem:[#allocation5 + $0x4c] ss:$16 sps:$4 sm:$0xff]  }
 0x1f9   :  { %v5469_v62 = vld [vmem:[#allocation5 + $0x24c] ss:$16 sps:$4 sm:$0xff]   ;;  %v5464_v63 = vld [vmem:[#allocation5 + $0x48] ss:$16 sps:$4 sm:$0xff]  }
 0x1fa   :  { %v1939_v7 = vcombine.high %v1937_v2, %v1937_v2  ;;  %v1972_v8 = vcombine.high %v1964_v3, %v1964_v3  ;;  %v1982_v13 = vunpack.i.h.s16 %v1964_v3  ;;  %v1984_v15 = vunpack.i.h.s16 %v1971_v6  ;;  %v5467_v0 = vld [vmem:[#allocation5 + $0x248] ss:$16 sps:$4 sm:$0xff]  }
 0x1fb   :  { %v2145_v17 = vcombine.low %v1930_v1, %v1937_v2  ;;  %v1938_v19 = vcombine.high %v1930_v1, %v1930_v1  ;;  %v1973_v20 = vcombine.high %v1971_v6, %v1971_v6  ;;  %v5472_v1 = vld [vmem:[#allocation5 + $0x2c] ss:$16 sps:$4 sm:$0xff]  }
 0x1fc   :  { %v1986_v21 = vunpack.i.h.s16 %v1972_v8  ;;  %v4734_v22 = vpack.i.b16 %v1964_v3, %v1939_v7  ;;  %v4735_v23 = vpack.i.b16 %v1971_v6, %v1982_v13  ;;  %v4736_v16 = vpack.i.b16 %v1972_v8, %v1984_v15  ;;  %v5475_v2 = vld [vmem:[#allocation5 + $0x22c] ss:$16 sps:$4 sm:$0xff]   ;;  %v5470_v3 = vld [vmem:[#allocation5 + $0x28] ss:$16 sps:$4 sm:$0xff]  }
 0x1fd   :  { %v2154_v27 = vrot.slane %v2145_v17, %v5879_v4  ;;  %v5473_v6 = vld [vmem:[#allocation5 + $0x228] ss:$16 sps:$4 sm:$0xff]   ;;  %v5478_v7 = vld [vmem:[#allocation5 + $0xc] ss:$16 sps:$4 sm:$0xff]  }
 0x1fe   :  { %v4737_v24 = vpack.i.b16 %v1973_v20, %v1986_v21  ;;  %v2146_v25 = vcombine.low %v1938_v19, %v4734_v22  ;;  %v2147_v26 = vcombine.low %v4735_v23, %v4736_v16  ;;  %v5481_v8 = vld [vmem:[#allocation5 + $0x20c] ss:$16 sps:$4 sm:$0xff]   ;;  %v5476_v13 = vld [vmem:[#allocation5 + $0x8] ss:$16 sps:$4 sm:$0xff]  }
 0x1ff   :  { %v5479_v15 = vld [vmem:[#allocation5 + $0x208] ss:$16 sps:$4 sm:$0xff]   ;;  %v5484_v17 = vld [vmem:[#allocation5 + $0x1ec] ss:$16 sps:$4 sm:$0xff]  }
 0x200   :  { %v2161_v28 = vrot.slane %v2146_v25, %v5879_v4  ;;  %v2175_v29 = vrot.slane %v4737_v24, %v5879_v4  ;;  %v2168_v30 = vrot.slane %v2147_v26, %v5879_v4  ;;  %v5487_v19 = vld [vmem:[#allocation5 + $0x3ec] ss:$16 sps:$4 sm:$0xff]   ;;  %v5482_v20 = vld [vmem:[#allocation5 + $0x1e8] ss:$16 sps:$4 sm:$0xff]  }
 0x201   :  { %v5485_v21 = vld [vmem:[#allocation5 + $0x3e8] ss:$16 sps:$4 sm:$0xff]   ;;  %v5490_v22 = vld [vmem:[#allocation5 + $0x1cc] ss:$16 sps:$4 sm:$0xff]  }
 0x202   :  { %v2177_v31 = vcombine.high %v2154_v27, %v2161_v28  ;;  %v2176_v32 = vcombine.low %v2154_v27, %v2161_v28  ;;  %v2179_v33 = vcombine.high %v2168_v30, %v2175_v29  ;;  %v2178_v34 = vcombine.low %v2168_v30, %v2175_v29  ;;  %v5493_v23 = vld [vmem:[#allocation5 + $0x3cc] ss:$16 sps:$4 sm:$0xff]   ;;  %v5488_v16 = vld [vmem:[#allocation5 + $0x1c8] ss:$16 sps:$4 sm:$0xff]  }
 0x203   :  { %v5491_v24 = vld [vmem:[#allocation5 + $0x3c8] ss:$16 sps:$4 sm:$0xff]   ;;  %v5496_v25 = vld [vmem:[#allocation5 + $0x1ac] ss:$16 sps:$4 sm:$0xff]  }
 0x204   :  { %v2193_v35 = vrot.slane %v2177_v31, %v5879_v4  ;;  %v2186_v36 = vrot.slane %v2176_v32, %v5879_v4  ;;  %v2207_v37 = vrot.slane %v2179_v33, %v5879_v4  ;;  %v2200_v38 = vrot.slane %v2178_v34, %v5879_v4  ;;  %v5499_v26 = vld [vmem:[#allocation5 + $0x3ac] ss:$16 sps:$4 sm:$0xff]   ;;  %v5494_v27 = vld [vmem:[#allocation5 + $0x1a8] ss:$16 sps:$4 sm:$0xff]  }
 0x205   :  { %v5497_v28 = vld [vmem:[#allocation5 + $0x3a8] ss:$16 sps:$4 sm:$0xff]   ;;  %v5502_v29 = vld [vmem:[#allocation5 + $0x18c] ss:$16 sps:$4 sm:$0xff]  }
 0x206   :  { %v2210_v40 = vcombine.low %v2193_v35, %v2207_v37  ;;  %v2211_v43 = vcombine.high %v2193_v35, %v2207_v37  ;;  %v5897_v45 = vcombine.low %v2186_v36, %v2200_v38  ;;  %v5899_v46 = vcombine.high %v2186_v36, %v2200_v38  ;;  %v5505_v30 = vld [vmem:[#allocation5 + $0x38c] ss:$16 sps:$4 sm:$0xff]   ;;  %v5500_v31 = vld [vmem:[#allocation5 + $0x188] ss:$16 sps:$4 sm:$0xff]  }
 0x207   :  { %v5503_v32 = vld [vmem:[#allocation5 + $0x388] ss:$16 sps:$4 sm:$0xff]   ;;  %v5508_v33 = vld [vmem:[#allocation5 + $0x16c] ss:$16 sps:$4 sm:$0xff]  }
 0x208   :  { %2888 = vmatprep.mubr.bf16.mxu1 %v2210_v40  ;;  %2931 = vmatprep.mubr.bf16.mxu0 %v2211_v43  ;;  %v5511_v34 = vld [vmem:[#allocation5 + $0x36c] ss:$16 sps:$4 sm:$0xff]   ;;  %v5506_v35 = vld [vmem:[#allocation5 + $0x168] ss:$16 sps:$4 sm:$0xff]  }
 0x209   :  { %2889 = vmatmul.mubr.bf16.vlgmr.msra.gmra.mxu1 %v5897_v45  ;;  %2932 = vmatmul.mubr.bf16.vlgmr.msra.gmra.mxu0 %v5899_v46  ;;  %v5509_v36 = vld [vmem:[#allocation5 + $0x368] ss:$16 sps:$4 sm:$0xff]   ;;  %v5514_v37 = vld [vmem:[#allocation5 + $0x14c] ss:$16 sps:$4 sm:$0xff]  }
 0x20a   :  { %2943 = vmatpush1.bf16.msra.mxu1 %v5434_v44  ;;  %2986 = vmatpush1.bf16.msra.mxu0 %v5437_v42  ;;  %v5517_v38 = vld [vmem:[#allocation5 + $0x34c] ss:$16 sps:$4 sm:$0xff]  }
 0x20b   :  { %2974 = vmatprep.mubr.bf16.mxu1 %v2210_v40  ;;  %3017 = vmatprep.mubr.bf16.mxu0 %v2211_v43  ;;  %v5512_v40 = vld [vmem:[#allocation5 + $0x148] ss:$16 sps:$4 sm:$0xff]   ;;  %v5520_v44 = vld [vmem:[#allocation5 + $0x12c] ss:$16 sps:$4 sm:$0xff]  }
 0x20c   :  { %2944 = vmatprep.subr.bf16.mxu1 %v5442_v47  ;;  %2987 = vmatprep.subr.bf16.mxu0 %v5445_v48  ;;  %v5515_v43 = vld [vmem:[#allocation5 + $0x348] ss:$16 sps:$4 sm:$0xff]   ;;  %v5523_v42 = vld [vmem:[#allocation5 + $0x32c] ss:$16 sps:$4 sm:$0xff]  }
 0x20d   :  { %v5518_v47 = vld [vmem:[#allocation5 + $0x128] ss:$16 sps:$4 sm:$0xff]  }
 0x20e   :  { %2945 = vmatpush1.bf16.msra.mxu1 %v5440_v49  ;;  %2988 = vmatpush1.bf16.msra.mxu0 %v5443_v50  ;;  %v5521_v48 = vld [vmem:[#allocation5 + $0x328] ss:$16 sps:$4 sm:$0xff]   ;;  %v5526_v49 = vld [vmem:[#allocation5 + $0x10c] ss:$16 sps:$4 sm:$0xff]  }
 0x20f   :  { %2946 = vmatprep.subr.bf16.mxu1 %v5448_v41  ;;  %2989 = vmatprep.subr.bf16.mxu0 %v5451_v51  ;;  %v5529_v50 = vld [vmem:[#allocation5 + $0x30c] ss:$16 sps:$4 sm:$0xff]   ;;  %v5524_v41 = vld [vmem:[#allocation5 + $0x108] ss:$16 sps:$4 sm:$0xff]  }
 0x210   :  { %v5527_v51 = vld [vmem:[#allocation5 + $0x308] ss:$16 sps:$4 sm:$0xff]  }
 0x212   :  { %2947 = vmatpush1.bf16.msra.mxu1 %v5446_v53  ;;  %2990 = vmatpush1.bf16.msra.mxu0 %v5449_v5  ;;  %v5530_v53 = vld [vmem:[%s6129_s5 + $0x78] sm:$0xff]  }
 0x213   :  { %2948 = vmatprep.subr.bf16.mxu1 %v5454_v18  ;;  %2991 = vmatprep.subr.bf16.mxu0 %v5457_v54  ;;  %v5531_v5 = vld [vmem:[%s6129_s5 + $0x38] sm:$0xff]   ;;  %v5532_v18 = vld [vmem:[%s6129_s5 + $0x70] sm:$0xff]   ;;  %v5535_v54 = vld [vmem:[%s6129_s5 + $0x28] sm:$0xff]  }
 0x216   :  { %2949 = vmatpush1.bf16.msra.mxu1 %v5452_v55  ;;  %2992 = vmatpush1.bf16.msra.mxu0 %v5455_v56  ;;  %v5536_v55 = vld [vmem:[%s6129_s5 + $0x60] sm:$0xff]  }
 0x217   :  { %2950 = vmatprep.subr.bf16.mxu1 %v5460_v57  ;;  %2993 = vmatprep.subr.bf16.mxu0 %v5463_v58  ;;  %v5537_v56 = vld [vmem:[%s6129_s5 + $0x20] sm:$0xff]   ;;  %v5538_v57 = vld [vmem:[%s6129_s5 + $0x58] sm:$0xff]  }
 0x218   :  { %v5539_v58 = vld [vmem:[%s6129_s5 + $0x18] sm:$0xff]  }
 0x21a   :  { %2951 = vmatpush1.bf16.msra.mxu1 %v5458_v59  ;;  %2994 = vmatpush1.bf16.msra.mxu0 %v5461_v60  ;;  %v5540_v59 = vld [vmem:[%s6129_s5 + $0x50] sm:$0xff]  }
 0x21b   :  { %2952 = vmatprep.subr.bf16.mxu1 %v5466_v61  ;;  %2995 = vmatprep.subr.bf16.mxu0 %v5469_v62  ;;  %v5541_v60 = vld [vmem:[%s6129_s5 + $0x10] sm:$0xff]   ;;  %v5542_v61 = vld [vmem:[%s6129_s5 + $0x48] sm:$0xff]  }
 0x21c   :  { %v5543_v62 = vld [vmem:[%s6129_s5 + $0x8] sm:$0xff]  }
 0x21e   :  { %2953 = vmatpush1.bf16.msra.mxu1 %v5464_v63  ;;  %2996 = vmatpush1.bf16.msra.mxu0 %v5467_v0  ;;  %v5544_v63 = vld [vmem:[%s6129_s5 + $0x40] sm:$0xff]  }
 0x21f   :  { %2954 = vmatprep.subr.bf16.mxu1 %v5472_v1  ;;  %2997 = vmatprep.subr.bf16.mxu0 %v5475_v2  ;;  %v5545_v0 = vld [vmem:[%s6129_s5] sm:$0xff]   ;;  %v5546_v1 = vld [vmem:[%s6129_s5 + $0xf8] sm:$0xff]  }
 0x222   :  { %2955 = vmatpush1.bf16.msra.mxu1 %v5470_v3  ;;  %2998 = vmatpush1.bf16.msra.mxu0 %v5473_v6 }
 0x223   :  { %2956 = vmatprep.subr.bf16.mxu1 %v5478_v7  ;;  %2999 = vmatprep.subr.bf16.mxu0 %v5481_v8  ;;  %v2116_v8 = vld [vmem:[%s6128_s4] sm:$0xf] }
 0x226   :  { %2957 = vmatpush1.bf16.msra.mxu1 %v5476_v13  ;;  %3000 = vmatpush1.bf16.msra.mxu0 %v5479_v15  ;;  %v2125_v13 = vrot.slane %v2116_v8, %v5827_v14  ;;  %v2121_v15 = vrot.slane %v2116_v8, %v5818_v11 }
 0x227   :  { %2958 = vmatprep.subr.bf16.mxu1 %v5484_v17  ;;  %3001 = vmatprep.subr.bf16.mxu0 %v5487_v19 }
 0x22a   :  { %2959 = vmatpush2.bf16.msra.mxu1 %v5482_v20  ;;  %3002 = vmatpush2.bf16.msra.mxu0 %v5485_v21  ;;  %v2129_v21 = vrot.slane %v2116_v8, %v5815_v10 }
 0x22b   :  { %2960 = vmatprep.subr.bf16.mxu1 %v5490_v22  ;;  %3003 = vmatprep.subr.bf16.mxu0 %v5493_v23 }
 0x22e   :  { %2961 = vmatpush2.bf16.msra.mxu1 %v5488_v16  ;;  %3004 = vmatpush2.bf16.msra.mxu0 %v5491_v24  ;;  %v2133_v24 = vrot.slane %v2116_v8, %v5821_v12 }
 0x22f   :  { %2962 = vmatprep.subr.bf16.mxu1 %v5496_v25  ;;  %3005 = vmatprep.subr.bf16.mxu0 %v5499_v26 }
 0x232   :  { %2963 = vmatpush2.bf16.msra.mxu1 %v5494_v27  ;;  %3006 = vmatpush2.bf16.msra.mxu0 %v5497_v28 }
 0x233   :  { %2964 = vmatprep.subr.bf16.mxu1 %v5502_v29  ;;  %3007 = vmatprep.subr.bf16.mxu0 %v5505_v30 }
 0x236   :  { %2965 = vmatpush2.bf16.msra.mxu1 %v5500_v31  ;;  %3008 = vmatpush2.bf16.msra.mxu0 %v5503_v32 }
 0x237   :  { %2966 = vmatprep.subr.bf16.mxu1 %v5508_v33  ;;  %3009 = vmatprep.subr.bf16.mxu0 %v5511_v34  ;;  %v5721_v34 = vmov 1935823168  }
 0x23a   :  { %2967 = vmatpush2.bf16.msra.mxu1 %v5506_v35  ;;  %3010 = vmatpush2.bf16.msra.mxu0 %v5509_v36  ;;  %v3214_v35 = vunpack.c.l.s4 %v5721_v34 }
 0x23b   :  { %2968 = vmatprep.subr.bf16.mxu1 %v5514_v37  ;;  %3011 = vmatprep.subr.bf16.mxu0 %v5517_v38 }
 0x23e   :  { %2969 = vmatpush2.bf16.msra.mxu1 %v5512_v40  ;;  %3012 = vmatpush2.bf16.msra.mxu0 %v5515_v43 }
 0x23f   :  { %2970 = vmatprep.subr.bf16.mxu1 %v5520_v44  ;;  %3013 = vmatprep.subr.bf16.mxu0 %v5523_v42 }
 0x242   :  { %2971 = vmatpush2.bf16.msra.mxu1 %v5518_v47  ;;  %3014 = vmatpush2.bf16.msra.mxu0 %v5521_v48 }
 0x243   :  { %2972 = vmatprep.subr.bf16.mxu1 %v5526_v49  ;;  %3015 = vmatprep.subr.bf16.mxu0 %v5529_v50 }
 0x246   :  { %2973 = vmatpush2.bf16.msra.mxu1 %v5524_v41  ;;  %3016 = vmatpush2.bf16.msra.mxu0 %v5527_v51  ;;  %v3215_v41 = vunpack.c.0.s8 %v3214_v35 }
 0x247   :  { %4922 = vmatprep.subr.bf16.mxu1 %v5530_v53 }
 0x249   :  { %2975 = vmatmul.mubr.bf16.vlgmr.msra.gmra.mxu1 %v5897_v45  ;;  %3018 = vmatmul.mubr.bf16.vlgmr.msra.gmra.mxu0 %v5899_v46  ;;  %v5533_v45 = vld [vmem:[%s6129_s5 + $0x30] sm:$0xff]   ;;  %v5534_v46 = vld [vmem:[%s6129_s5 + $0x68] sm:$0xff]  }
 0x24a   :  { %4923 = vmatpush3.bf16.msra.mxu1 %v5531_v5 }
 0x24b   :  { %4924 = vmatprep.subr.bf16.mxu1 %v5532_v18 }
 0x24e   :  { %4925 = vmatpush3.bf16.msra.mxu1 %v5533_v45 }
 0x24f   :  { %4926 = vmatprep.subr.bf16.mxu1 %v5534_v46 }
 0x252   :  { %4927 = vmatpush3.bf16.msra.mxu1 %v5535_v54 }
 0x253   :  { %4928 = vmatprep.subr.bf16.mxu1 %v5536_v55 }
 0x256   :  { %4929 = vmatpush3.bf16.msra.mxu1 %v5537_v56 }
 0x257   :  { %4930 = vmatprep.subr.bf16.mxu1 %v5538_v57 }
 0x25a   :  { %4931 = vmatpush3.bf16.msra.mxu1 %v5539_v58 }
 0x25b   :  { %4932 = vmatprep.subr.bf16.mxu1 %v5540_v59 }
 0x25e   :  { %4933 = vmatpush3.bf16.msra.mxu1 %v5541_v60  ;;  %v5968_v60 = vsub.s32 %v3215_v41, %v5812_v9 }
 0x25f   :  { %4934 = vmatprep.subr.bf16.mxu1 %v5542_v61 }
 0x262   :  { %4935 = vmatpush3.bf16.msra.mxu1 %v5543_v62 }
 0x263   :  { %4936 = vmatprep.subr.bf16.mxu1 %v5544_v63 }
 0x266   :  { %4937 = vmatpush3.bf16.msra.mxu1 %v5545_v0 }
 0x267   :  { %4950 = vmatprep.subr.bf16.mxu1 %v5546_v1 }
 0x2c9   :  { %v2890_v2 = vpop.f32.mrf.mxu1  ;;  %v2933_v3 = vpop.f32.mrf.mxu0 }
 0x2ca   :  { %v2891_v22 = vadd.f32 %v2890_v2, %v2121_v15 }
 0x2cb   :  { %v2892_v6 = vpop.f32.mrf.mxu1  ;;  %v2935_v7 = vpop.f32.mrf.mxu0 }
 0x2cc   :  { %v2893_v20 = vadd.f32 %v2892_v6, %v2125_v13  ;;  %v2934_v29 = vadd.f32 %v2933_v3, %v2891_v22 }
 0x2cd   :  { %v2894_v17 = vpop.f32.mrf.mxu1  ;;  %v2937_v19 = vpop.f32.mrf.mxu0 }
 0x2ce   :  { %v2936_v25 = vadd.f32 %v2935_v7, %v2893_v20  ;;  %v2895_v33 = vadd.f32 %v2894_v17, %v2121_v15 }
 0x2cf   :  { %v2896_v23 = vpop.f32.mrf.mxu1  ;;  %v2939_v16 = vpop.f32.mrf.mxu0 }
 0x2d0   :  { %v2897_v30 = vadd.f32 %v2896_v23, %v2125_v13  ;;  %v3036_v11 = vcombine.low %v2934_v29, %v2936_v25  ;;  %v3037_v37 = vcombine.high %v2934_v29, %v2936_v25  ;;  %v2938_v50 = vadd.f32 %v2937_v19, %v2895_v33 }
 0x2d2   :  { %v2940_v43 = vadd.f32 %v2939_v16, %v2897_v30  ;;  %v3046_v49 = vrot.slane %v3036_v11, %v5879_v4  ;;  %v3053_v53 = vrot.slane %v3037_v37, %v5879_v4 }
 0x2d4   :  { %v3104_v46 = vcombine.low %v2938_v50, %v2940_v43  ;;  %v3105_v54 = vcombine.high %v2938_v50, %v2940_v43 }
 0x2d6   :  { %v3114_v3 = vrot.slane %v3104_v46, %v5879_v4  ;;  %v3121_v6 = vrot.slane %v3105_v54, %v5879_v4 }
 0x309   :  { %v2976_v26 = vpop.f32.mrf.mxu1  ;;  %v3019_v27 = vpop.f32.mrf.mxu0 }
 0x30a   :  { %v2977_v28 = vadd.f32 %v2976_v26, %v2129_v21 }
 0x30b   :  { %v2978_v31 = vpop.f32.mrf.mxu1  ;;  %v3021_v14 = vpop.f32.mrf.mxu0 }
 0x30c   :  { %v2979_v32 = vadd.f32 %v2978_v31, %v2133_v24  ;;  %v3020_v38 = vadd.f32 %v3019_v27, %v2977_v28 }
 0x30d   :  { %v2980_v36 = vpop.f32.mrf.mxu1  ;;  %v3023_v10 = vpop.f32.mrf.mxu0 }
 0x30e   :  { %v3022_v40 = vadd.f32 %v3021_v14, %v2979_v32  ;;  %v2981_v12 = vadd.f32 %v2980_v36, %v2129_v21 }
 0x30f   :  { %v2982_v44 = vpop.f32.mrf.mxu1  ;;  %v3025_v51 = vpop.f32.mrf.mxu0 }
 0x310   :  { %v3038_v42 = vcombine.low %v3020_v38, %v3022_v40  ;;  %v3039_v47 = vcombine.high %v3020_v38, %v3022_v40  ;;  %v2983_v48 = vadd.f32 %v2982_v44, %v2133_v24  ;;  %v3024_v55 = vadd.f32 %v3023_v10, %v2981_v12 }
 0x312   :  { %v3060_v5 = vrot.slane %v3038_v42, %v5879_v4  ;;  %v3067_v18 = vrot.slane %v3039_v47, %v5879_v4  ;;  %v3026_v45 = vadd.f32 %v3025_v51, %v2983_v48 }
 0x314   :  { %v3068_v56 = vcombine.low %v3046_v49, %v3060_v5  ;;  %v3069_v57 = vcombine.high %v3046_v49, %v3060_v5  ;;  %v3070_v58 = vcombine.low %v3053_v53, %v3067_v18  ;;  %v3071_v59 = vcombine.high %v3053_v53, %v3067_v18 }
 0x315   :  { %v3106_v61 = vcombine.low %v3024_v55, %v3026_v45  ;;  %v3107_v62 = vcombine.high %v3024_v55, %v3026_v45 }
 0x316   :  { %v3078_v63 = vrot.slane %v3068_v56, %v5879_v4  ;;  %v3085_v0 = vrot.slane %v3070_v58, %v5879_v4  ;;  %v3092_v1 = vrot.slane %v3069_v57, %v5879_v4  ;;  %v3099_v2 = vrot.slane %v3071_v59, %v5879_v4 }
 0x317   :  { %v3128_v7 = vrot.slane %v3106_v61, %v5879_v4  ;;  %v3135_v8 = vrot.slane %v3107_v62, %v5879_v4 }
 0x318   :  { %v3100_v9 = vcombine.high %v3078_v63, %v3078_v63  ;;  %v3101_v13 = vcombine.high %v3085_v0, %v3085_v0  ;;  %v3102_v15 = vcombine.high %v3092_v1, %v3092_v1  ;;  %v3103_v17 = vcombine.high %v3099_v2, %v3099_v2 }
 0x319   :  { %v3184_v19 = vmax.f32 %v3078_v63, 0.0  ;;  %v3185_v20 = vmax.f32 %v3092_v1, 0.0  ;;  %v3188_v21 = vmax.f32 %v3085_v0, 0.0  ;;  %v3189_v22 = vmax.f32 %v3099_v2, 0.0 }
 0x31a   :  { %v3186_v23 = vmax.f32 %v3100_v9, 0.0  ;;  %v3187_v16 = vmax.f32 %v3102_v15, 0.0  ;;  %v3190_v24 = vmax.f32 %v3101_v13, 0.0  ;;  %v3191_v25 = vmax.f32 %v3103_v17, 0.0 }
 0x31b   :  { %v3212_v26 = vcombine.low %v3184_v19, %v3185_v20  ;;  %v3228_v27 = vcombine.low %v3188_v21, %v3189_v22  ;;  %v3136_v28 = vcombine.low %v3114_v3, %v3128_v7  ;;  %v3137_v29 = vcombine.high %v3114_v3, %v3128_v7 }
 0x31c   :  { %v3220_v30 = vcombine.low %v3186_v23, %v3187_v16  ;;  %v3242_v31 = vrot.slane %v3190_v24, %v5968_v60  ;;  %v3138_v14 = vcombine.low %v3121_v6, %v3135_v8  ;;  %v3139_v32 = vcombine.high %v3121_v6, %v3135_v8 }
 0x31d   :  { %v3219_v11 = vrot.slane %v3212_v26, %v5968_v60  ;;  %v3235_v33 = vrot.slane %v3228_v27, %v5968_v60  ;;  %v3146_v34 = vrot.slane %v3136_v28, %v5879_v4  ;;  %v3160_v35 = vrot.slane %v3137_v29, %v5879_v4 }
 0x31e   :  { %v3227_v36 = vrot.slane %v3220_v30, %v5968_v60  ;;  %v3309_v10 = vrot.slane %v3242_v31, %v5968_v60  ;;  %v3153_v37 = vrot.slane %v3138_v14, %v5879_v4  ;;  %v3167_v38 = vrot.slane %v3139_v32, %v5879_v4 }
 0x31f   :  { %v3288_v40 = vrot.slane %v3219_v11, %v5968_v60  ;;  %v3302_v43 = vrot.slane %v3235_v33, %v5968_v60  ;;  %v3168_v12 = vcombine.high %v3146_v34, %v3146_v34  ;;  %v3169_v44 = vcombine.high %v3160_v35, %v3160_v35 }
 0x320   :  { %v3295_v42 = vrot.slane %v3227_v36, %v5968_v60  ;;  %v3192_v47 = vmax.f32 %v3146_v34, 0.0  ;;  %v3193_v48 = vmax.f32 %v3160_v35, 0.0  ;;  %v3196_v49 = vmax.f32 %v3153_v37, 0.0 }
 0x321   :  { %v3348_v50 = vcombine.low %v3302_v43, %v3309_v10  ;;  %v3349_v41 = vcombine.high %v3302_v43, %v3309_v10  ;;  %v3194_v51 = vmax.f32 %v3168_v12, 0.0  ;;  %v3195_v53 = vmax.f32 %v3169_v44, 0.0 }
 0x322   :  { %v3346_v5 = vcombine.low %v3288_v40, %v3295_v42  ;;  %v3347_v18 = vcombine.high %v3288_v40, %v3295_v42  ;;  %v3197_v45 = vmax.f32 %v3167_v38, 0.0  ;;  %v3243_v46 = vcombine.low %v3191_v25, %v3192_v47 }
 0x323   :  { %v3356_v54 = vrot.slane %v3348_v50, 1  ;;  %v3359_v55 = vrot.slane %v3349_v41, 1  ;;  %v3251_v56 = vcombine.low %v3193_v48, %v3194_v51  ;;  %v3259_v61 = vcombine.low %v3195_v53, %v3196_v49 }
 0x324   :  { %v3355_v57 = vrot.slane %v3346_v5, 1  ;;  %v3358_v58 = vrot.slane %v3347_v18, 1  ;;  %v3250_v59 = vrot.slane %v3243_v46, %v5968_v60  ;;  %v3273_v63 = vrot.slane %v3197_v45, %v5968_v60 }
 0x325   :  { %v3258_v62 = vrot.slane %v3251_v56, %v5968_v60  ;;  %v3376_v0 = vsel %vm3375_vm1, %v3356_v54, 0.0  ;;  %v3377_v1 = vsel %vm3375_vm1, %v3359_v55, 0.0  ;;  %v4867_v2 = vpack.c.bf16 %v3349_v41, %v3348_v50 }
 0x326   :  { %v3266_v3 = vrot.slane %v3259_v61, %v5968_v60  ;;  %v3357_v6 = vsel %vm3354_vm2, %v3355_v57, %v3356_v54  ;;  %v3360_v7 = vsel %vm3354_vm2, %v3358_v58, %v3359_v55  ;;  %v3316_v8 = vrot.slane %v3250_v59, %v5968_v60 }
 0x327   :  { %v3323_v9 = vrot.slane %v3258_v62, %v5968_v60  ;;  %v4866_v13 = vpack.c.bf16 %v3347_v18, %v3346_v5  ;;  %v4868_v15 = vpack.c.bf16 %v3360_v7, %v3357_v6  ;;  %v3337_v19 = vrot.slane %v3273_v63, %v5968_v60 }
 0x328   :  { %v3330_v17 = vrot.slane %v3266_v3, %v5968_v60  ;;  %v4869_v20 = vpack.c.bf16 %v3377_v1, %v3376_v0  ;;  %v3421_v26 = vrot.slane %v4867_v2, %v5879_v4 }
 0x329   :  { %v3350_v21 = vcombine.low %v3316_v8, %v3323_v9  ;;  %v3351_v22 = vcombine.high %v3316_v8, %v3323_v9  ;;  %v3414_v23 = vrot.slane %v4866_v13, %v5879_v4  ;;  %v3428_v16 = vrot.slane %v4868_v15, %v5879_v4 }
 0x32a   :  { %v3352_v24 = vcombine.low %v3330_v17, %v3337_v19  ;;  %v3353_v25 = vcombine.high %v3330_v17, %v3337_v19  ;;  %v3435_v27 = vrot.slane %v4869_v20, %v5879_v4 }
 0x32b   :  { %v3361_v28 = vrot.slane %v3350_v21, 1  ;;  %v3364_v29 = vrot.slane %v3351_v22, 1  ;;  %v3436_v30 = vcombine.low %v3414_v23, %v3428_v16  ;;  %v3437_v31 = vcombine.high %v3414_v23, %v3428_v16 }
 0x32c   :  { %v3362_v14 = vrot.slane %v3352_v24, 1  ;;  %v3365_v32 = vrot.slane %v3353_v25, 1  ;;  %v4871_v60 = vpack.c.bf16 %v3353_v25, %v3352_v24  ;;  %v3438_v11 = vcombine.low %v3421_v26, %v3435_v27 }
 0x32d   :  { %v3439_v33 = vcombine.high %v3421_v26, %v3435_v27  ;;  %v3446_v34 = vrot.slane %v3436_v30, %v5879_v4  ;;  %v3460_v35 = vrot.slane %v3437_v31, %v5879_v4  ;;  %v4870_v36 = vpack.c.bf16 %v3351_v22, %v3350_v21 }
 0x32e   :  { %v3378_v10 = vsel %vm3375_vm1, %v3362_v14, 0.0  ;;  %v3379_v37 = vsel %vm3375_vm1, %v3365_v32, 0.0  ;;  %v3363_v38 = vsel %vm3354_vm2, %v3361_v28, %v3362_v14  ;;  %v3366_v40 = vsel %vm3354_vm2, %v3364_v29, %v3365_v32  ;;  %v5547_v29 = vld [vmem:[%s6129_s5 + $0xb8] sm:$0xff]   ;;  %v5548_v14 = vld [vmem:[%s6129_s5 + $0xf0] sm:$0xff]  }
 0x32f   :  { %v3453_v43 = vrot.slane %v3438_v11, %v5879_v4  ;;  %v3467_v12 = vrot.slane %v3439_v33, %v5879_v4  ;;  %v4872_v44 = vpack.c.bf16 %v3366_v40, %v3363_v38  ;;  %v3609_v42 = vcombine.low %v3446_v34, %v3460_v35  ;;  %v5549_v11 = vld [vmem:[%s6129_s5 + $0xb0] sm:$0xff]   ;;  %v5550_v33 = vld [vmem:[%s6129_s5 + $0xe8] sm:$0xff]   ;;  %v5553_v40 = vld [vmem:[%s6129_s5 + $0xa0] sm:$0xff]  }
 0x330   :  { %v4875_v47 = vcombine.high %v3446_v34, %v3460_v35  ;;  %v4873_v48 = vpack.c.bf16 %v3379_v37, %v3378_v10  ;;  %v3481_v49 = vrot.slane %v4870_v36, %v5879_v4  ;;  %v3488_v41 = vrot.slane %v4871_v60, %v5879_v4  ;;  %v5551_v36 = vld [vmem:[%s6129_s5 + $0xa8] sm:$0xff]   ;;  %v5552_v37 = vld [vmem:[%s6129_s5 + $0xe0] sm:$0xff]  }
 0x331   :  { %v3495_v50 = vrot.slane %v4872_v44, %v5879_v4  ;;  %v3611_v5 = vcombine.low %v3453_v43, %v3467_v12  ;;  %v3619_v45 = vrot.slane %v3609_v42, %v5879_v4  ;;  %v3469_v56 = vcombine.high %v3453_v43, %v3453_v43  ;;  %v5555_v43 = vld [vmem:[%s6129_s5 + $0x98] sm:$0xff]   ;;  %v5556_v12 = vld [vmem:[%s6129_s5 + $0xd0] sm:$0xff]   ;;  %v5558_v42 = vld [vmem:[%s6129_s5 + $0xc8] sm:$0xff]  }
 0x332   :  { %v3502_v51 = vrot.slane %v4873_v48, %v5879_v4  ;;  %v3626_v46 = vrot.slane %v4875_v47, %v5879_v4  ;;  %v5557_v44 = vld [vmem:[%s6129_s5 + $0x90] sm:$0xff]   ;;  %v5559_v47 = vld [vmem:[%s6129_s5 + $0x88] sm:$0xff]   ;;  %v5560_v48 = vld [vmem:[%s6129_s5 + $0xc0] sm:$0xff]   ;;  %vm4484_vm1 = vcmask 1043458  }
 0x333   :  { %v3503_v53 = vcombine.low %v3481_v49, %v3495_v50  ;;  %v3504_v18 = vcombine.high %v3481_v49, %v3495_v50  ;;  %v3633_v0 = vrot.slane %v3611_v5, %v5879_v4  ;;  %v5561_v49 = vld [vmem:[%s6129_s5 + $0x80] sm:$0xff]   ;;  %vm4485_vm2 = vmor %vm4484_vm1, %vm4483_vm0 }
 0x334   :  { %v3505_v54 = vcombine.low %v3488_v41, %v3502_v51  ;;  %v3506_v55 = vcombine.high %v3488_v41, %v3502_v51  ;;  %v3642_v1 = vcombine.high %v3619_v45, %v3626_v46  ;;  %v3641_v7 = vcombine.low %v3619_v45, %v3626_v46 }
 0x335   :  { %v3513_v57 = vrot.slane %v3503_v53, %v5879_v4  ;;  %v3527_v58 = vrot.slane %v3504_v18, %v5879_v4 }
 0x336   :  { %v3520_v59 = vrot.slane %v3505_v54, %v5879_v4  ;;  %v3534_v2 = vrot.slane %v3506_v55, %v5879_v4  ;;  %v3658_v21 = vrot.slane %v3642_v1, %v5879_v4  ;;  %v3651_v16 = vrot.slane %v3641_v7, %v5879_v4 }
 0x337   :  { %v3612_v61 = vcombine.low %v3469_v56, %v3513_v57  ;;  %v3535_v62 = vcombine.high %v3513_v57, %v3513_v57  ;;  %v3537_v63 = vcombine.high %v3527_v58, %v3527_v58 }
 0x338   :  { %v3536_v3 = vcombine.high %v3520_v59, %v3520_v59 }
 0x339   :  { %v3640_v6 = vrot.slane %v3612_v61, %v5879_v4  ;;  %v3677_v8 = vcombine.low %v3527_v58, %v3535_v62  ;;  %v3678_v9 = vcombine.low %v3537_v63, %v3520_v59  ;;  %v4874_v58 = vld [vmem:[%s6130_s6] ss:$0 sm:$0xff]  ;;  %s5724_s6 = smov 80  }
 0x33a   :  { %v3679_v13 = vcombine.low %v3534_v2, %v3536_v3 }
 0x33b   :  { %v3644_v15 = vcombine.high %v3633_v0, %v3640_v6  ;;  %v3643_v17 = vcombine.low %v3633_v0, %v3640_v6  ;;  %v3686_v19 = vrot.slane %v3677_v8, %v5879_v4  ;;  %v3693_v20 = vrot.slane %v3678_v9, %v5879_v4 }
 0x33c   :  { %v3700_v22 = vrot.slane %v3679_v13, %v5879_v4 }
 0x33d   :  { %v3672_v23 = vrot.slane %v3644_v15, %v5879_v4  ;;  %v3665_v24 = vrot.slane %v3643_v17, %v5879_v4  ;;  %v3702_v25 = vcombine.high %v3686_v19, %v3693_v20  ;;  %v3701_v32 = vcombine.low %v3686_v19, %v3693_v20 }
 0x33e   :  { %v3703_v26 = vcombine.high %v3700_v22, %v3700_v22  ;;  %v3724_v35 = vrot.slane %v3700_v22, %v5879_v4 }
 0x33f   :  { %v3675_v27 = vcombine.low %v3658_v21, %v3672_v23  ;;  %v3673_v28 = vcombine.low %v3651_v16, %v3665_v24  ;;  %v3717_v30 = vrot.slane %v3702_v25, %v5879_v4  ;;  %v3710_v34 = vrot.slane %v3701_v32, %v5879_v4 }
 0x340   :  { %v3731_v31 = vrot.slane %v3703_v26, %v5879_v4  ;;  %v3676_v38 = vcombine.high %v3658_v21, %v3672_v23  ;;  %v5554_v4 = vld [vmem:[%s6129_s5 + $0xd8] sm:$0xff]   ;;  %v3674_v50 = vcombine.high %v3651_v16, %v3665_v24  ;;  %s5723_s5 = smov 112  }
 0x341   :  { %3968 = vmatprep.mubr.bf16.mxu1 %v3675_v27  ;;  %v3732_v10 = vcombine.low %v3710_v34, %v3724_v35  ;;  %v3733_v51 = vcombine.high %v3710_v34, %v3724_v35 }
 0x342   :  { %3969 = vmatmul.mubr.bf16.vlgmr.msra.gmra.mxu1 %v3673_v28  ;;  %v3734_v60 = vcombine.low %v3717_v30, %v3731_v31  ;;  %v3735_v41 = vcombine.high %v3717_v30, %v3731_v31 }
 0x343   :  { %4951 = vmatpush3.bf16.msra.mxu1 %v5547_v29 }
 0x344   :  { %3976 = vmatprep.mubr.bf16.mxu1 %v3734_v60  ;;  %4952 = vmatprep.subr.bf16.mxu1 %v5548_v14 }
 0x347   :  { %4953 = vmatpush3.bf16.msra.mxu1 %v5549_v11 }
 0x348   :  { %4954 = vmatprep.subr.bf16.mxu1 %v5550_v33 }
 0x34a   :  { %3977 = vmatmul.mubr.bf16.gmra.mxu1 %v3732_v10 }
 0x34b   :  { %4955 = vmatpush3.bf16.msra.mxu1 %v5551_v36  ;;  %4017 = vmatprep.mubr.bf16.mxu1 %v3676_v38 }
 0x34c   :  { %4956 = vmatprep.subr.bf16.mxu1 %v5552_v37 }
 0x34f   :  { %4957 = vmatpush3.bf16.msra.mxu1 %v5553_v40 }
 0x350   :  { %4958 = vmatprep.subr.bf16.mxu1 %v5554_v4 }
 0x353   :  { %4959 = vmatpush3.bf16.msra.mxu1 %v5555_v43 }
 0x354   :  { %4960 = vmatprep.subr.bf16.mxu1 %v5556_v12 }
 0x357   :  { %4961 = vmatpush3.bf16.msra.mxu1 %v5557_v44 }
 0x358   :  { %4962 = vmatprep.subr.bf16.mxu1 %v5558_v42 }
 0x35b   :  { %4963 = vmatpush3.bf16.msra.mxu1 %v5559_v47 }
 0x35c   :  { %4964 = vmatprep.subr.bf16.mxu1 %v5560_v48 }
 0x35f   :  { %4965 = vmatpush3.bf16.msra.mxu1 %v5561_v49 }
 0x362   :  { %4018 = vmatmul.mubr.bf16.vlgmr.msra.gmra.mxu1 %v3674_v50 }
 0x363   :  { %4025 = vmatprep.mubr.bf16.mxu1 %v3735_v41 }
 0x36a   :  { %4026 = vmatmul.mubr.bf16.gmra.mxu1 %v3733_v51 }
 0x402   :  { %v4938_v53 = vpop.f32.mrf.mxu1 }
 0x404   :  { %v4939_v5 = vpop.f32.mrf.mxu1 }
 0x405   :  { %v4940_v57 = vadd.f32 %v4939_v5, %v4938_v53 }
 0x406   :  { %v4941_v18 = vpop.f32.mrf.mxu1 }
 0x407   :  { %v3971_v62 = vadd.f32 %v4940_v57, %v4874_v58 }
 0x408   :  { %v4942_v45 = vpop.f32.mrf.mxu1 }
 0x409   :  { %v4943_v63 = vadd.f32 %v4942_v45, %v4941_v18 }
 0x40a   :  { %v4944_v46 = vpop.f32.mrf.mxu1 }
 0x40b   :  { %v3974_v6 = vadd.f32 %v4943_v63, %v4874_v58 }
 0x40c   :  { %v4945_v54 = vpop.f32.mrf.mxu1 }
 0x40d   :  { %v4946_v13 = vadd.f32 %v4945_v54, %v4944_v46 }
 0x40e   :  { %v4947_v55 = vpop.f32.mrf.mxu1 }
 0x40f   :  { %v3979_v29 = vadd.f32 %v4946_v13, %v4874_v58 }
 0x410   :  { %v4948_v56 = vpop.f32.mrf.mxu1 }
 0x411   :  { %v4949_v23 = vadd.f32 %v4948_v56, %v4947_v55 }
 0x413   :  { %v3982_v33 = vadd.f32 %v4949_v23, %v4874_v58 }
 0x422   :  { %v4966_v59 = vpop.f32.mrf.mxu1 }
 0x424   :  { %v4967_v61 = vpop.f32.mrf.mxu1 }
 0x425   :  { %v4968_v0 = vadd.f32 %v4967_v61, %v4966_v59 }
 0x426   :  { %v4969_v1 = vpop.f32.mrf.mxu1 }
 0x427   :  { %v4020_v2 = vadd.f32 %v4968_v0, %v3971_v62 }
 0x428   :  { %v4970_v3 = vpop.f32.mrf.mxu1 }
 0x429   :  { %v4038_v7 = vcombine.high %v4020_v2, %v4020_v2  ;;  %v4045_v8 = vrot.slane %v4020_v2, %v5846_v39  ;;  %v4971_v9 = vadd.f32 %v4970_v3, %v4969_v1 }
 0x42a   :  { %v4972_v15 = vpop.f32.mrf.mxu1 }
 0x42b   :  { %v4052_v17 = vrot.slane %v4038_v7, %v5846_v39  ;;  %v4053_v19 = vcombine.high %v4045_v8, %v4045_v8  ;;  %v4908_v20 = vmul.f32 -1.442695, %v4045_v8  ;;  %v4023_v21 = vadd.f32 %v4971_v9, %v3974_v6 }
 0x42c   :  { %v4973_v22 = vpop.f32.mrf.mxu1 }
 0x42d   :  { %v4054_v16 = vcombine.high %v4052_v17, %v4052_v17  ;;  %5562 = vpow2.f32 %v4908_v20  ;;  %v4909_v24 = vmul.f32 -1.442695, %v4053_v19  ;;  %v4055_v25 = vcombine.high %v4023_v21, %v4023_v21 }
 0x42e   :  { %v4062_v26 = vrot.slane %v4023_v21, %v5846_v39  ;;  %v4974_v27 = vadd.f32 %v4973_v22, %v4972_v15  ;;  %v4975_v28 = vpop.f32.mrf.mxu1  ;;  %v4910_v30 = vmul.f32 -1.442695, %v4052_v17 }
 0x42f   :  { %5564 = vpow2.f32 %v4909_v24  ;;  %v4911_v31 = vmul.f32 -1.442695, %v4054_v16  ;;  %v4069_v14 = vrot.slane %v4055_v25, %v5846_v39 }
 0x430   :  { %v4070_v32 = vcombine.high %v4062_v26, %v4062_v26  ;;  %v4912_v60 = vmul.f32 -1.442695, %v4062_v26  ;;  %v4976_v11 = vpop.f32.mrf.mxu1  ;;  %v4028_v34 = vadd.f32 %v4974_v27, %v3979_v29 }
 0x431   :  { %5566 = vpow2.f32 %v4911_v31  ;;  %v4977_v35 = vadd.f32 %v4976_v11, %v4975_v28  ;;  %v4071_v36 = vcombine.high %v4069_v14, %v4069_v14  ;;  %v4914_v4 = vmul.f32 -1.442695, %v4069_v14 }
 0x432   :  { %v4913_v10 = vmul.f32 -1.442695, %v4070_v32  ;;  %5568 = vpow2.f32 %v4910_v30  ;;  %v4072_v37 = vcombine.high %v4028_v34, %v4028_v34  ;;  %v4079_v38 = vrot.slane %v4028_v34, %v5846_v39 }
 0x433   :  { %v4031_v40 = vadd.f32 %v4977_v35, %v3982_v33  ;;  %5570 = vpow2.f32 %v4912_v60  ;;  %v4915_v43 = vmul.f32 -1.442695, %v4071_v36 }
 0x434   :  { %5572 = vpow2.f32 %v4913_v10  ;;  %v4086_v12 = vrot.slane %v4072_v37, %v5846_v39  ;;  %v4087_v44 = vcombine.high %v4079_v38, %v4079_v38  ;;  %v4916_v42 = vmul.f32 -1.442695, %v4079_v38 }
 0x435   :  { %5574 = vpow2.f32 %v4915_v43  ;;  %v4095_v47 = vrot.slane %v4031_v40, %v5846_v39 }
 0x436   :  { %v4088_v48 = vcombine.high %v4086_v12, %v4086_v12  ;;  %5576 = vpow2.f32 %v4916_v42  ;;  %v4917_v49 = vmul.f32 -1.442695, %v4087_v44  ;;  %v4918_v50 = vmul.f32 -1.442695, %v4086_v12 }
 0x437   :  { %5578 = vpow2.f32 %v4914_v4  ;;  %v4096_v51 = vcombine.high %v4095_v47, %v4095_v47  ;;  %v4920_v53 = vmul.f32 -1.442695, %v4095_v47 }
 0x438   :  { %5580 = vpow2.f32 %v4917_v49  ;;  %v4919_v41 = vmul.f32 -1.442695, %v4088_v48  ;;  %v5722_v49 = vmov 0.0  }
 0x439   :  { %5582 = vpow2.f32 %v4918_v50  ;;  %v4921_v46 = vmul.f32 -1.442695, %v4096_v51 }
 0x43a   :  { %v5563_v5 = vpop.eup %5562  ;;  %5584 = vpow2.f32 %v4919_v41 }
 0x43b   :  { %v4153_v45 = vadd.f32 1.0, %v5563_v5  ;;  %5586 = vpow2.f32 %v4920_v53 }
 0x43c   :  { %v5565_v18 = vpop.eup %5564 }
 0x43d   :  { %v4154_v55 = vadd.f32 1.0, %v5565_v18  ;;  %5588 = vrcp.f32 %v4153_v45 }
 0x43e   :  { %v5567_v54 = vpop.eup %5566  ;;  %5590 = vpow2.f32 %v4921_v46 }
 0x43f   :  { %v4156_v56 = vadd.f32 1.0, %v5567_v54  ;;  %v5569_v57 = vpop.eup %5568  ;;  %5592 = vrcp.f32 %v4154_v55 }
 0x440   :  { %v5571_v58 = vpop.eup %5570  ;;  %v4155_v63 = vadd.f32 1.0, %v5569_v57 }
 0x441   :  { %v5573_v59 = vpop.eup %5572  ;;  %5594 = vrcp.f32 %v4156_v56  ;;  %v4157_v13 = vadd.f32 1.0, %v5571_v58 }
 0x442   :  { %v5575_v61 = vpop.eup %5574  ;;  %v4158_v19 = vadd.f32 1.0, %v5573_v59 }
 0x443   :  { %v5577_v62 = vpop.eup %5576  ;;  %v4160_v0 = vadd.f32 1.0, %v5575_v61 }
 0x444   :  { %v5579_v1 = vpop.eup %5578  ;;  %v4161_v2 = vadd.f32 1.0, %v5577_v62 }
 0x445   :  { %v5581_v3 = vpop.eup %5580  ;;  %5596 = vrcp.f32 %v4160_v0  ;;  %v4159_v20 = vadd.f32 1.0, %v5579_v1 }
 0x446   :  { %v5583_v6 = vpop.eup %5582  ;;  %v4162_v7 = vadd.f32 1.0, %v5581_v3  ;;  %5598 = vrcp.f32 %v4161_v2 }
 0x447   :  { %v5585_v8 = vpop.eup %5584  ;;  %5600 = vrcp.f32 %v4155_v63  ;;  %v4163_v9 = vadd.f32 1.0, %v5583_v6 }
 0x448   :  { %v4164_v15 = vadd.f32 1.0, %v5585_v8  ;;  %5602 = vrcp.f32 %v4162_v7  ;;  %v5587_v17 = vpop.eup %5586 }
 0x449   :  { %5604 = vrcp.f32 %v4163_v9  ;;  %v4165_v22 = vadd.f32 1.0, %v5587_v17 }
 0x44a   :  { %5606 = vrcp.f32 %v4164_v15  ;;  %v5589_v21 = vpop.eup %5588 }
 0x44b   :  { %5608 = vrcp.f32 %v4157_v13  ;;  %v5591_v23 = vpop.eup %5590 }
 0x44c   :  { %5610 = vrcp.f32 %v4158_v19  ;;  %v5593_v16 = vpop.eup %5592  ;;  %v4166_v25 = vadd.f32 1.0, %v5591_v23 }
 0x44d   :  { %5612 = vrcp.f32 %v4159_v20 }
 0x44e   :  { %v5595_v24 = vpop.eup %5594  ;;  %5614 = vtanh.f32 %v5589_v21 }
 0x44f   :  { %5616 = vrcp.f32 %v4165_v22 }
 0x450   :  { %5618 = vtanh.f32 %v5593_v16 }
 0x451   :  { %5620 = vtanh.f32 %v5595_v24 }
 0x452   :  { %v5597_v26 = vpop.eup %5596 }
 0x453   :  { %v5599_v27 = vpop.eup %5598  ;;  %5622 = vtanh.f32 %v5597_v26 }
 0x454   :  { %v5601_v28 = vpop.eup %5600  ;;  %5624 = vtanh.f32 %v5599_v27 }
 0x455   :  { %v5603_v29 = vpop.eup %5602  ;;  %5626 = vrcp.f32 %v4166_v25 }
 0x456   :  { %v5605_v30 = vpop.eup %5604  ;;  %5628 = vtanh.f32 %v5603_v29 }
 0x457   :  { %5630 = vtanh.f32 %v5605_v30  ;;  %v5607_v31 = vpop.eup %5606 }
 0x458   :  { %5632 = vtanh.f32 %v5601_v28  ;;  %v5609_v14 = vpop.eup %5608 }
 0x459   :  { %v5611_v32 = vpop.eup %5610  ;;  %5634 = vtanh.f32 %v5607_v31 }
 0x45a   :  { %v5613_v60 = vpop.eup %5612  ;;  %5636 = vtanh.f32 %v5609_v14 }
 0x45b   :  { %v5615_v11 = vpop.eup %5614 }
 0x45c   :  { %v5617_v33 = vpop.eup %5616 }
 0x45d   :  { %v5619_v34 = vpop.eup %5618  ;;  %5638 = vtanh.f32 %v5617_v33 }
 0x45e   :  { %v5621_v35 = vpop.eup %5620  ;;  %5640 = vtanh.f32 %v5611_v32 }
 0x460   :  { %v5623_v36 = vpop.eup %5622 }
 0x461   :  { %v5625_v10 = vpop.eup %5624  ;;  %v4209_v37 = vcombine.low %v5615_v11, %v5623_v36 }
 0x462   :  { %v5627_v38 = vpop.eup %5626  ;;  %v4218_v40 = vcombine.low %v5619_v34, %v5625_v10 }
 0x463   :  { %v5629_v4 = vpop.eup %5628  ;;  %5642 = vtanh.f32 %v5627_v38  ;;  %v6093_v43 = vrot.slane %v4209_v37, %v5868_v52 }
 0x464   :  { %v5631_v12 = vpop.eup %5630  ;;  %5644 = vtanh.f32 %v5613_v60  ;;  %v4225_v44 = vrot.slane %v4218_v40, %v5868_v52 }
 0x465   :  { %v5633_v42 = vpop.eup %5632  ;;  %v4236_v47 = vcombine.low %v5621_v35, %v5631_v12  ;;  %v4217_v50 = vcombine.high %v6093_v43, %v5722_v49 }
 0x466   :  { %v4290_v48 = vrot.slane %v4225_v44, %v5846_v39  ;;  %v4227_v41 = vcombine.low %v5633_v42, %v5629_v4  ;;  %v5635_v51 = vpop.eup %5634  ;;  %v4226_v18 = vcombine.high %v4225_v44, %v5722_v49 }
 0x467   :  { %v4243_v53 = vrot.slane %v4236_v47, %v5868_v52  ;;  %v5637_v5 = vpop.eup %5636  ;;  %v4279_v46 = vrot.slane %v4217_v50, %v5846_v39 }
 0x468   :  { %4291 = vrot.lane.b32.xlu1 %v4290_v48, %s5723_s5  ;;  %v4234_v54 = vrot.slane %v4227_v41, %v5868_v52  ;;  %v4245_v55 = vcombine.low %v5637_v5, %v5635_v51  ;;  %v4301_v59 = vrot.slane %v4226_v18, %v5846_v39 }
 0x469   :  { %v4334_v45 = vrot.slane %v4243_v53, %v5846_v39  ;;  %v4244_v58 = vcombine.high %v4243_v53, %v5722_v49 }
 0x46a   :  { %v5639_v56 = vpop.eup %5638  ;;  %v4312_v61 = vrot.slane %v4234_v54, %v5846_v39  ;;  %v4252_v62 = vrot.slane %v4245_v55, %v5868_v52  ;;  %v4235_v3 = vcombine.high %v4234_v54, %v5722_v49 }
 0x46b   :  { %4335 = vrot.lane.b32.xlu0 %v4334_v45, %s5724_s6  ;;  %v5641_v57 = vpop.eup %5640  ;;  %v4345_v2 = vrot.slane %v4244_v58, %v5846_v39 }
 0x46c   :  { %4280 = vrot.lane.b32.xlu1 %v4279_v46, %s5714_s28  ;;  %v4254_v63 = vcombine.low %v5641_v57, %v5639_v56  ;;  %v4356_v6 = vrot.slane %v4252_v62, %v5846_v39  ;;  %s5727_s28 = smov 8   ;;  %v4323_v9 = vrot.slane %v4235_v3, %v5846_v39  ;;  %v4253_v13 = vcombine.high %v4252_v62, %v5722_v49 }
 0x46e   :  { %v4261_v7 = vrot.slane %v4254_v63, %v5868_v52  ;;  %v4367_v19 = vrot.slane %v4253_v13, %v5846_v39 }
 0x46f   :  { %4302 = vrot.lane.b32.xlu0 %v4301_v59, %s5725_s9 }
 0x470   :  { %v5643_v0 = vpop.eup %5642  ;;  %4313 = vrot.lane.b32.xlu1 %v4312_v61, %s5726_s10  ;;  %v4378_v15 = vrot.slane %v4261_v7, %v5846_v39  ;;  %v4262_v20 = vcombine.high %v4261_v7, %v5722_v49 }
 0x471   :  { %v5645_v1 = vpop.eup %5644 }
 0x472   :  { %v4263_v8 = vcombine.low %v5645_v1, %v5643_v0  ;;  %v4389_v22 = vrot.slane %v4262_v20, %v5846_v39 }
 0x473   :  { %4346 = vrot.lane.b32.xlu0 %v4345_v2, %s5727_s28 }
 0x474   :  { %4357 = vrot.lane.b32.xlu1 %v4356_v6, %s5728_s11  ;;  %v4270_v17 = vrot.slane %v4263_v8, %v5868_v52 }
 0x476   :  { %v4400_v21 = vrot.slane %v4270_v17, %v5846_v39  ;;  %v4271_v23 = vcombine.high %v4270_v17, %v5722_v49 }
 0x477   :  { %4324 = vrot.lane.b32.xlu0 %v4323_v9, %s5729_s12 }
 0x478   :  { %4379 = vrot.lane.b32.xlu1 %v4378_v15, %s5730_s13  ;;  %v4411_v52 = vrot.slane %v4271_v23, %v5846_v39 }
 0x47b   :  { %4368 = vrot.lane.b32.xlu0 %v4367_v19, %s5731_s14 }
 0x47c   :  { %4401 = vrot.lane.b32.xlu1 %v4400_v21, %s5732_s1 }
 0x47f   :  { %4390 = vrot.lane.b32.xlu0 %v4389_v22, %s5733_s3 }
 0x483   :  { %4412 = vrot.lane.b32.xlu0 %v4411_v52, %s5734_s0 }
 0x4da   :  { %v4292_v16 = vpop.permute.xlu1 %4291 }
 0x4dd   :  { %v4336_v24 = vpop.permute.xlu0 %4335 }
 0x4de   :  { %v4281_v25 = vpop.permute.xlu1 %4280 }
 0x4df   :  { %v4416_v31 = vsel %vm4415_vm4, %v6093_v43, %v4281_v25 }
 0x4e0   :  { %v4418_v33 = vsel %vm4417_vm8, %v4416_v31, %v4292_v16 }
 0x4e1   :  { %v4303_v26 = vpop.permute.xlu0 %4302 }
 0x4e2   :  { %v4314_v27 = vpop.permute.xlu1 %4313  ;;  %v4420_v29 = vsel %vm4419_vm3, %v4292_v16, %v4303_v26  ;;  %vm4486_vm3 = vcmask 128004  }
 0x4e3   :  { %v4422_v32 = vsel %vm4421_vm5, %v4420_v29, %v4314_v27  ;;  %vm4487_vm4 = vmor %vm4486_vm3, %vm4485_vm2 }
 0x4e4   :  { %v4447_v34 = vcombine.low %v4418_v33, %v4422_v32 }
 0x4e5   :  { %v4347_v28 = vpop.permute.xlu0 %4346 }
 0x4e6   :  { %v4358_v30 = vpop.permute.xlu1 %4357  ;;  %v4428_v60 = vsel %vm4427_vm6, %v4336_v24, %v4347_v28  ;;  %v4455_v4 = vrot.slane %v4447_v34, %v5846_v39 }
 0x4e7   :  { %v4430_v35 = vsel %vm4429_vm9, %v4428_v60, %v4358_v30 }
 0x4e9   :  { %v4325_v14 = vpop.permute.xlu0 %4324 }
 0x4ea   :  { %v4424_v11 = vsel %vm4423_vm7, %v4314_v27, %v4325_v14  ;;  %v4380_v10 = vpop.permute.xlu1 %4379 }
 0x4eb   :  { %v4426_v37 = vsel %vm4425_vm10, %v4424_v11, %v4336_v24 }
 0x4ed   :  { %v4369_v36 = vpop.permute.xlu0 %4368 }
 0x4ee   :  { %v4432_v38 = vsel %vm4431_vm11, %v4430_v35, %v4369_v36  ;;  %v4402_v42 = vpop.permute.xlu1 %4401  ;;  %v4434_v47 = vsel %vm4433_vm12, %v4369_v36, %v4380_v10 }
 0x4ef   :  { %v4448_v40 = vcombine.low %v4426_v37, %v4432_v38 }
 0x4f1   :  { %v4462_v43 = vrot.slane %v4448_v40, %v5846_v39  ;;  %v4391_v12 = vpop.permute.xlu0 %4390 }
 0x4f2   :  { %v4438_v48 = vsel %vm4437_vm13, %v4391_v12, %v4402_v42  ;;  %v4436_v50 = vsel %vm4435_vm14, %v4434_v47, %v4391_v12 }
 0x4f3   :  { %v4463_v44 = vcombine.low %v4455_v4, %v4462_v43 }
 0x4f5   :  { %v4413_v49 = vpop.permute.xlu0 %4412  ;;  %4482 = vst [vmem:[#allocation7] sm:$0xff] %v4463_v44 }
 0x4f6   :  { %v4440_v41 = vsel %vm4439_vm15, %v4438_v48, %v4413_v49  ;;  %v4478_v5 = vrot.slane %v4413_v49, %v5846_v39 }
 0x4f7   :  { %v4464_v51 = vcombine.low %v4436_v50, %v4440_v41 }
 0x4f9   :  { %v4471_v53 = vrot.slane %v4464_v51, %v5846_v39 }
 0x4fb   :  { %v4479_v18 = vcombine.low %v4471_v53, %v4478_v5 }
 0x4fd   :  { %4488 = vst.msk [vmem:[#allocation7 + $0x8] sm:$0x3f] %vm4487_vm4, %v4479_v18 }
 0x4fe   :  { %5697 = shalt.err (!%p5694_p0)
}
 0x4ff   :  { %4498 = dma.vmem_to_hbm [thread:$0]  %s4496_s16, 224, %s6131_s7, [#allocation4]  }
 0x500   :  { %5710 = dma.done.wait [#allocation4], 224  }
 0x501   :  { %5711 = vsyncadd [#allocation4], 4294967072 }
 0x502   :  { %4502 = vsyncpa [#allocation3], 1 }
 0x503   :  { %4503 = vsyncpa [#allocation6], 1 }
 0x504   :  { %4504 = vsyncpa [#allocation4], 1 }

</bundles_post_ra>
